<compile_context>
chip_gen: v7x
topology: tpu7x:2x2x1
jax: 0.10.0
libtpu: 0.0.40
codegen_flags: <defaults>
</compile_context>

<pallas_src>
import math
import jax
import jax.numpy as jnp
from jax.experimental import pallas as pl
from jax.experimental.pallas import tpu as pltpu

# ----------------------------- model dimensions -----------------------------
B = 2           # batch
S = 8           # sequence length
H = 128         # hidden size (stand-in for roberta's 768)
F = 256         # FFN intermediate size
DENSE = 512     # head dense size (matches nn.Linear(hidden, 512))
N_LABELS = 6    # multi-label toxicity (jigsaw-style 6 labels)
OUT_PAD = 128   # lane-dense padded logit width (sliced to N_LABELS outside)
VOCAB = 1000
LN_EPS = 1e-5
NEG_INF = -1e9


# ------------------------------ fused kernel ---------------------------------
def fused_kernel(ids_ref,                  # SMEM (B, S) int32 (scalar prefetch)
                 mask_ref,                 # (B, S) f32
                 tok_emb_ref,              # (VOCAB, H) f32, resident in VMEM
                 pos_emb_ref,              # (S, H) f32
                 wqkv_ref, bqkv_ref,       # (H, 3H) bf16, (1, 3H) f32
                 wo_ref, bo_ref,           # (H, H) bf16, (1, H) f32
                 ln1_g_ref, ln1_b_ref,     # (1, H) f32
                 w1_ref, b1_ref,           # (H, F) bf16, (1, F) f32
                 w2_ref, b2_ref,           # (F, H) bf16, (1, H) f32
                 ln2_g_ref, ln2_b_ref,     # (1, H) f32
                 dense_w_ref, dense_b_ref, # (H, DENSE) bf16, (1, DENSE) f32
                 out_w_ref, out_b_ref,     # (DENSE, OUT_PAD) bf16, (1, OUT_PAD) f32
                 out_ref,                  # (B, OUT_PAD) f32
                 x_scr):                   # VMEM scratch (B*S, H) f32
    # ---- embedding gather: rows from the resident table, ids from SMEM ----
    for b in range(B):
        for s in range(S):
            tid = ids_ref[b, s]
            x_scr[pl.ds(b * S + s, 1), :] = tok_emb_ref[pl.ds(tid, 1), :]
    x = (x_scr[...].reshape(B, S, H) + pos_emb_ref[...][None, :, :]).reshape(B * S, H)

    # ---- fused QKV projection on the flattened (B*S, H) LHS ----
    qkv = jnp.dot(x.astype(jnp.bfloat16), wqkv_ref[...],
                  preferred_element_type=jnp.float32) + bqkv_ref[...]
    q = qkv[:, 0 * H:1 * H].reshape(B, S, H).astype(jnp.bfloat16)
    k = qkv[:, 1 * H:2 * H].reshape(B, S, H).astype(jnp.bfloat16)
    v = qkv[:, 2 * H:3 * H].reshape(B, S, H).astype(jnp.bfloat16)

    # ---- single-head masked self-attention (head_dim == H) ----
    scale = 1.0 / math.sqrt(H)
    bias = (1.0 - mask_ref[...])[:, None, :] * NEG_INF            # (B, 1, S)
    scores = jnp.einsum('bqd,bkd->bqk', q, k,
                        preferred_element_type=jnp.float32) * scale + bias
    m = jnp.max(scores, axis=-1, keepdims=True)
    p = jnp.exp(scores - m)
    p = p * pl.reciprocal(jnp.sum(p, axis=-1, keepdims=True), approx=True)
    attn = jnp.einsum('bqk,bkd->bqd', p.astype(jnp.bfloat16), v,
                      preferred_element_type=jnp.float32).reshape(B * S, H)
    attn = jnp.dot(attn.astype(jnp.bfloat16), wo_ref[...],
                   preferred_element_type=jnp.float32) + bo_ref[...]

    # ---- residual + layernorm 1 (f32) ----
    h = x + attn
    mu = jnp.mean(h, axis=-1, keepdims=True)
    var = jnp.mean(jnp.square(h - mu), axis=-1, keepdims=True)
    h = (h - mu) * jax.lax.rsqrt(var + LN_EPS) * ln1_g_ref[...] + ln1_b_ref[...]

    # ---- FFN (bf16 matmuls, f32 accumulation) ----
    # TODO(synk): PyTorch RoBERTa uses the exact erf-GELU; tanh approximation here.
    f = jnp.dot(h.astype(jnp.bfloat16), w1_ref[...],
                preferred_element_type=jnp.float32) + b1_ref[...]
    f = jax.nn.gelu(f, approximate=True)
    f = jnp.dot(f.astype(jnp.bfloat16), w2_ref[...],
                preferred_element_type=jnp.float32) + b2_ref[...]

    # ---- residual + layernorm 2 ----
    h2 = h + f
    mu2 = jnp.mean(h2, axis=-1, keepdims=True)
    var2 = jnp.mean(jnp.square(h2 - mu2), axis=-1, keepdims=True)
    hidden = (h2 - mu2) * jax.lax.rsqrt(var2 + LN_EPS) * ln2_g_ref[...] + ln2_b_ref[...]

    # ---- CLS pooling + classifier head (dropouts are identity in eval) ----
    cls = hidden.reshape(B, S, H)[:, 0, :]                        # (B, H)
    d = jnp.dot(cls.astype(jnp.bfloat16), dense_w_ref[...],
                preferred_element_type=jnp.float32) + dense_b_ref[...]
    d = jnp.maximum(d, 0.0)
    logits = jnp.dot(d.astype(jnp.bfloat16), out_w_ref[...],
                     preferred_element_type=jnp.float32) + out_b_ref[...]
    out_ref[...] = jax.nn.sigmoid(logits)                         # (B, OUT_PAD)


def _full(shape):
    # whole-array block; index_map gets (grid_i, ids_prefetch_ref)
    return pl.BlockSpec(shape, lambda i, ids: (0,) * len(shape))


# ------------------------------ forward (glue) --------------------------------
def toxicity_classifier_forward(input_ids, attention_mask, params):
    mask_f = attention_mask.astype(jnp.float32)
    in_specs = [
        _full((B, S)),                            # attention mask
        _full((VOCAB, H)), _full((S, H)),         # token / position embeddings
        _full((H, 3 * H)), _full((1, 3 * H)),     # fused Wqkv, bqkv
        _full((H, H)), _full((1, H)),             # Wo, bo
        _full((1, H)), _full((1, H)),             # ln1 gamma/beta
        _full((H, F)), _full((1, F)),             # FFN W1, b1
        _full((F, H)), _full((1, H)),             # FFN W2, b2
        _full((1, H)), _full((1, H)),             # ln2 gamma/beta
        _full((H, DENSE)), _full((1, DENSE)),     # head dense
        _full((DENSE, OUT_PAD)), _full((1, OUT_PAD)),  # head output (lane-padded)
    ]
    padded = pl.pallas_call(
        fused_kernel,
        out_shape=jax.ShapeDtypeStruct((B, OUT_PAD), jnp.float32),
        grid_spec=pltpu.PrefetchScalarGridSpec(
            num_scalar_prefetch=1,
            grid=(1,),
            in_specs=in_specs,
            out_specs=pl.BlockSpec((B, OUT_PAD), lambda i, ids: (0, 0)),
            scratch_shapes=[pltpu.VMEM((B * S, H), jnp.float32)],
        ),
        compiler_params=pltpu.CompilerParams(
            dimension_semantics=("arbitrary",)),
    )(input_ids, mask_f,
      params["tok_emb"], params["pos_emb"],
      params["wqkv"], params["bqkv"], params["wo"], params["bo"],
      params["ln1_g"], params["ln1_b"],
      params["w1"], params["b1"], params["w2"], params["b2"],
      params["ln2_g"], params["ln2_b"],
      params["dense_w"], params["dense_b"],
      params["out_w"], params["out_b"])
    return padded[:, :N_LABELS]


# --------------------------- parameter construction --------------------------
def make_params(key):
    ks = jax.random.split(key, 10)
    n = lambda k, shape, s=0.02: jax.random.normal(k, shape, jnp.float32) * s
    wq, wk, wv = n(ks[2], (H, H)), n(ks[3], (H, H)), n(ks[4], (H, H))
    out_w = jnp.zeros((DENSE, OUT_PAD), jnp.float32).at[:, :N_LABELS].set(
        n(ks[9], (DENSE, N_LABELS)))
    return {
        # stand-in "roberta" embeddings + one encoder layer
        "tok_emb": n(ks[0], (VOCAB, H)),
        "pos_emb": n(ks[1], (S, H)),
        "wqkv": jnp.concatenate([wq, wk, wv], axis=1).astype(jnp.bfloat16),
        "bqkv": jnp.zeros((1, 3 * H), jnp.float32),
        "wo": n(ks[5], (H, H)).astype(jnp.bfloat16),
        "bo": jnp.zeros((1, H), jnp.float32),
        "ln1_g": jnp.ones((1, H), jnp.float32),
        "ln1_b": jnp.zeros((1, H), jnp.float32),
        "w1": n(ks[6], (H, F)).astype(jnp.bfloat16),
        "b1": jnp.zeros((1, F), jnp.float32),
        "w2": n(ks[7], (F, H)).astype(jnp.bfloat16),
        "b2": jnp.zeros((1, H), jnp.float32),
        "ln2_g": jnp.ones((1, H), jnp.float32),
        "ln2_b": jnp.zeros((1, H), jnp.float32),
        # classifier head
        "dense_w": n(ks[8], (H, DENSE)).astype(jnp.bfloat16),
        "dense_b": jnp.zeros((1, DENSE), jnp.float32),
        "out_w": out_w.astype(jnp.bfloat16),
        "out_b": jnp.zeros((1, OUT_PAD), jnp.float32),
    }


if __name__ == "__main__":
    key = jax.random.PRNGKey(0)
    pkey, idkey = jax.random.split(key)
    params = make_params(pkey)

    input_ids = jax.random.randint(idkey, (B, S), 0, VOCAB, dtype=jnp.int32)
    attention_mask = jnp.ones((B, S), dtype=jnp.int32)

    probs = toxicity_classifier_forward(input_ids, attention_mask, params)
    probs = jax.block_until_ready(probs)
    assert probs.shape == (B, N_LABELS)
    assert bool(jnp.all((probs >= 0.0) & (probs <= 1.0)))
    print("KERNEL_OK")
</pallas_src>

<mosaic_0001>
module attributes {stable_mosaic.version = 11 : i64} {
  func.func @fused_kernel(%arg0: i32, %arg1: memref<2x8xi32, #tpu.memory_space<smem>>, %arg2: memref<2x8xf32, #tpu.memory_space<vmem>>, %arg3: memref<1000x128xf32, #tpu.memory_space<vmem>>, %arg4: memref<8x128xf32, #tpu.memory_space<vmem>>, %arg5: memref<128x384xbf16, #tpu.memory_space<vmem>>, %arg6: memref<1x384xf32, #tpu.memory_space<vmem>>, %arg7: memref<128x128xbf16, #tpu.memory_space<vmem>>, %arg8: memref<1x128xf32, #tpu.memory_space<vmem>>, %arg9: memref<1x128xf32, #tpu.memory_space<vmem>>, %arg10: memref<1x128xf32, #tpu.memory_space<vmem>>, %arg11: memref<128x256xbf16, #tpu.memory_space<vmem>>, %arg12: memref<1x256xf32, #tpu.memory_space<vmem>>, %arg13: memref<256x128xbf16, #tpu.memory_space<vmem>>, %arg14: memref<1x128xf32, #tpu.memory_space<vmem>>, %arg15: memref<1x128xf32, #tpu.memory_space<vmem>>, %arg16: memref<1x128xf32, #tpu.memory_space<vmem>>, %arg17: memref<128x512xbf16, #tpu.memory_space<vmem>>, %arg18: memref<1x512xf32, #tpu.memory_space<vmem>>, %arg19: memref<512x128xbf16, #tpu.memory_space<vmem>>, %arg20: memref<1x128xf32, #tpu.memory_space<vmem>>, %arg21: memref<2x128xf32, #tpu.memory_space<vmem>>, %arg22: memref<16x128xf32, #tpu.memory_space<vmem>>) attributes {dimension_semantics = [#tpu.dimension_semantics<arbitrary>], iteration_bounds = array<i64: 1>, scalar_prefetch = 1 : i64, scratch_operands = 1 : i64, tpu.core_type = #tpu.core_type<tc>, window_params = [{pipeline_mode = #tpu.pipeline_mode<synchronous>, transform_indices = @transform_0, window_bounds = array<i64: 2, 8>}, {pipeline_mode = #tpu.pipeline_mode<synchronous>, transform_indices = @transform_1, window_bounds = array<i64: 1000, 128>}, {pipeline_mode = #tpu.pipeline_mode<synchronous>, transform_indices = @transform_2, window_bounds = array<i64: 8, 128>}, {pipeline_mode = #tpu.pipeline_mode<synchronous>, transform_indices = @transform_3, window_bounds = array<i64: 128, 384>}, {pipeline_mode = #tpu.pipeline_mode<synchronous>, transform_indices = @transform_4, window_bounds = array<i64: 1, 384>}, {pipeline_mode = #tpu.pipeline_mode<synchronous>, transform_indices = @transform_5, window_bounds = array<i64: 128, 128>}, {pipeline_mode = #tpu.pipeline_mode<synchronous>, transform_indices = @transform_6, window_bounds = array<i64: 1, 128>}, {pipeline_mode = #tpu.pipeline_mode<synchronous>, transform_indices = @transform_7, window_bounds = array<i64: 1, 128>}, {pipeline_mode = #tpu.pipeline_mode<synchronous>, transform_indices = @transform_8, window_bounds = array<i64: 1, 128>}, {pipeline_mode = #tpu.pipeline_mode<synchronous>, transform_indices = @transform_9, window_bounds = array<i64: 128, 256>}, {pipeline_mode = #tpu.pipeline_mode<synchronous>, transform_indices = @transform_10, window_bounds = array<i64: 1, 256>}, {pipeline_mode = #tpu.pipeline_mode<synchronous>, transform_indices = @transform_11, window_bounds = array<i64: 256, 128>}, {pipeline_mode = #tpu.pipeline_mode<synchronous>, transform_indices = @transform_12, window_bounds = array<i64: 1, 128>}, {pipeline_mode = #tpu.pipeline_mode<synchronous>, transform_indices = @transform_13, window_bounds = array<i64: 1, 128>}, {pipeline_mode = #tpu.pipeline_mode<synchronous>, transform_indices = @transform_14, window_bounds = array<i64: 1, 128>}, {pipeline_mode = #tpu.pipeline_mode<synchronous>, transform_indices = @transform_15, window_bounds = array<i64: 128, 512>}, {pipeline_mode = #tpu.pipeline_mode<synchronous>, transform_indices = @transform_16, window_bounds = array<i64: 1, 512>}, {pipeline_mode = #tpu.pipeline_mode<synchronous>, transform_indices = @transform_17, window_bounds = array<i64: 512, 128>}, {pipeline_mode = #tpu.pipeline_mode<synchronous>, transform_indices = @transform_18, window_bounds = array<i64: 1, 128>}, {pipeline_mode = #tpu.pipeline_mode<synchronous>, transform_indices = @transform_19, window_bounds = array<i64: 2, 128>}]} {
    %c0 = arith.constant 0 : index
    %c0_0 = arith.constant 0 : index
    %0 = memref.load %arg1[%c0, %c0_0] : memref<2x8xi32, #tpu.memory_space<smem>>
    %1 = arith.index_cast %0 : i32 to index
    %c0_1 = arith.constant 0 : index
    %2 = vector.load %arg3[%1, %c0_1] : memref<1000x128xf32, #tpu.memory_space<vmem>>, vector<1x128xf32>
    %c0_2 = arith.constant 0 : index
    %c0_3 = arith.constant 0 : index
    %3 = vector.load %arg22[%c0_2, %c0_3] : memref<16x128xf32, #tpu.memory_space<vmem>>, vector<1x128xf32>
    tpu.vector_store %arg22[%c0_2, %c0_3], %2 {strides = array<i32>} : memref<16x128xf32, #tpu.memory_space<vmem>>, vector<1x128xf32>,
    %c0_4 = arith.constant 0 : index
    %c1 = arith.constant 1 : index
    %4 = memref.load %arg1[%c0_4, %c1] : memref<2x8xi32, #tpu.memory_space<smem>>
    %5 = arith.index_cast %4 : i32 to index
    %c0_5 = arith.constant 0 : index
    %6 = vector.load %arg3[%5, %c0_5] : memref<1000x128xf32, #tpu.memory_space<vmem>>, vector<1x128xf32>
    %c1_6 = arith.constant 1 : index
    %c0_7 = arith.constant 0 : index
    %7 = vector.load %arg22[%c1_6, %c0_7] : memref<16x128xf32, #tpu.memory_space<vmem>>, vector<1x128xf32>
    tpu.vector_store %arg22[%c1_6, %c0_7], %6 {strides = array<i32>} : memref<16x128xf32, #tpu.memory_space<vmem>>, vector<1x128xf32>,
    %c0_8 = arith.constant 0 : index
    %c2 = arith.constant 2 : index
    %8 = memref.load %arg1[%c0_8, %c2] : memref<2x8xi32, #tpu.memory_space<smem>>
    %9 = arith.index_cast %8 : i32 to index
    %c0_9 = arith.constant 0 : index
    %10 = vector.load %arg3[%9, %c0_9] : memref<1000x128xf32, #tpu.memory_space<vmem>>, vector<1x128xf32>
    %c2_10 = arith.constant 2 : index
    %c0_11 = arith.constant 0 : index
    %11 = vector.load %arg22[%c2_10, %c0_11] : memref<16x128xf32, #tpu.memory_space<vmem>>, vector<1x128xf32>
    tpu.vector_store %arg22[%c2_10, %c0_11], %10 {strides = array<i32>} : memref<16x128xf32, #tpu.memory_space<vmem>>, vector<1x128xf32>,
    %c0_12 = arith.constant 0 : index
    %c3 = arith.constant 3 : index
    %12 = memref.load %arg1[%c0_12, %c3] : memref<2x8xi32, #tpu.memory_space<smem>>
    %13 = arith.index_cast %12 : i32 to index
    %c0_13 = arith.constant 0 : index
    %14 = vector.load %arg3[%13, %c0_13] : memref<1000x128xf32, #tpu.memory_space<vmem>>, vector<1x128xf32>
    %c3_14 = arith.constant 3 : index
    %c0_15 = arith.constant 0 : index
    %15 = vector.load %arg22[%c3_14, %c0_15] : memref<16x128xf32, #tpu.memory_space<vmem>>, vector<1x128xf32>
    tpu.vector_store %arg22[%c3_14, %c0_15], %14 {strides = array<i32>} : memref<16x128xf32, #tpu.memory_space<vmem>>, vector<1x128xf32>,
    %c0_16 = arith.constant 0 : index
    %c4 = arith.constant 4 : index
    %16 = memref.load %arg1[%c0_16, %c4] : memref<2x8xi32, #tpu.memory_space<smem>>
    %17 = arith.index_cast %16 : i32 to index
    %c0_17 = arith.constant 0 : index
    %18 = vector.load %arg3[%17, %c0_17] : memref<1000x128xf32, #tpu.memory_space<vmem>>, vector<1x128xf32>
    %c4_18 = arith.constant 4 : index
    %c0_19 = arith.constant 0 : index
    %19 = vector.load %arg22[%c4_18, %c0_19] : memref<16x128xf32, #tpu.memory_space<vmem>>, vector<1x128xf32>
    tpu.vector_store %arg22[%c4_18, %c0_19], %18 {strides = array<i32>} : memref<16x128xf32, #tpu.memory_space<vmem>>, vector<1x128xf32>,
    %c0_20 = arith.constant 0 : index
    %c5 = arith.constant 5 : index
    %20 = memref.load %arg1[%c0_20, %c5] : memref<2x8xi32, #tpu.memory_space<smem>>
    %21 = arith.index_cast %20 : i32 to index
    %c0_21 = arith.constant 0 : index
    %22 = vector.load %arg3[%21, %c0_21] : memref<1000x128xf32, #tpu.memory_space<vmem>>, vector<1x128xf32>
    %c5_22 = arith.constant 5 : index
    %c0_23 = arith.constant 0 : index
    %23 = vector.load %arg22[%c5_22, %c0_23] : memref<16x128xf32, #tpu.memory_space<vmem>>, vector<1x128xf32>
    tpu.vector_store %arg22[%c5_22, %c0_23], %22 {strides = array<i32>} : memref<16x128xf32, #tpu.memory_space<vmem>>, vector<1x128xf32>,
    %c0_24 = arith.constant 0 : index
    %c6 = arith.constant 6 : index
    %24 = memref.load %arg1[%c0_24, %c6] : memref<2x8xi32, #tpu.memory_space<smem>>
    %25 = arith.index_cast %24 : i32 to index
    %c0_25 = arith.constant 0 : index
    %26 = vector.load %arg3[%25, %c0_25] : memref<1000x128xf32, #tpu.memory_space<vmem>>, vector<1x128xf32>
    %c6_26 = arith.constant 6 : index
    %c0_27 = arith.constant 0 : index
    %27 = vector.load %arg22[%c6_26, %c0_27] : memref<16x128xf32, #tpu.memory_space<vmem>>, vector<1x128xf32>
    tpu.vector_store %arg22[%c6_26, %c0_27], %26 {strides = array<i32>} : memref<16x128xf32, #tpu.memory_space<vmem>>, vector<1x128xf32>,
    %c0_28 = arith.constant 0 : index
    %c7 = arith.constant 7 : index
    %28 = memref.load %arg1[%c0_28, %c7] : memref<2x8xi32, #tpu.memory_space<smem>>
    %29 = arith.index_cast %28 : i32 to index
    %c0_29 = arith.constant 0 : index
    %30 = vector.load %arg3[%29, %c0_29] : memref<1000x128xf32, #tpu.memory_space<vmem>>, vector<1x128xf32>
    %c7_30 = arith.constant 7 : index
    %c0_31 = arith.constant 0 : index
    %31 = vector.load %arg22[%c7_30, %c0_31] : memref<16x128xf32, #tpu.memory_space<vmem>>, vector<1x128xf32>
    tpu.vector_store %arg22[%c7_30, %c0_31], %30 {strides = array<i32>} : memref<16x128xf32, #tpu.memory_space<vmem>>, vector<1x128xf32>,
    %c1_32 = arith.constant 1 : index
    %c0_33 = arith.constant 0 : index
    %32 = memref.load %arg1[%c1_32, %c0_33] : memref<2x8xi32, #tpu.memory_space<smem>>
    %33 = arith.index_cast %32 : i32 to index
    %c0_34 = arith.constant 0 : index
    %34 = vector.load %arg3[%33, %c0_34] : memref<1000x128xf32, #tpu.memory_space<vmem>>, vector<1x128xf32>
    %c8 = arith.constant 8 : index
    %c0_35 = arith.constant 0 : index
    %35 = vector.load %arg22[%c8, %c0_35] : memref<16x128xf32, #tpu.memory_space<vmem>>, vector<1x128xf32>
    tpu.vector_store %arg22[%c8, %c0_35], %34 {strides = array<i32>} : memref<16x128xf32, #tpu.memory_space<vmem>>, vector<1x128xf32>,
    %c1_36 = arith.constant 1 : index
    %c1_37 = arith.constant 1 : index
    %36 = memref.load %arg1[%c1_36, %c1_37] : memref<2x8xi32, #tpu.memory_space<smem>>
    %37 = arith.index_cast %36 : i32 to index
    %c0_38 = arith.constant 0 : index
    %38 = vector.load %arg3[%37, %c0_38] : memref<1000x128xf32, #tpu.memory_space<vmem>>, vector<1x128xf32>
    %c9 = arith.constant 9 : index
    %c0_39 = arith.constant 0 : index
    %39 = vector.load %arg22[%c9, %c0_39] : memref<16x128xf32, #tpu.memory_space<vmem>>, vector<1x128xf32>
    tpu.vector_store %arg22[%c9, %c0_39], %38 {strides = array<i32>} : memref<16x128xf32, #tpu.memory_space<vmem>>, vector<1x128xf32>,
    %c1_40 = arith.constant 1 : index
    %c2_41 = arith.constant 2 : index
    %40 = memref.load %arg1[%c1_40, %c2_41] : memref<2x8xi32, #tpu.memory_space<smem>>
    %41 = arith.index_cast %40 : i32 to index
    %c0_42 = arith.constant 0 : index
    %42 = vector.load %arg3[%41, %c0_42] : memref<1000x128xf32, #tpu.memory_space<vmem>>, vector<1x128xf32>
    %c10 = arith.constant 10 : index
    %c0_43 = arith.constant 0 : index
    %43 = vector.load %arg22[%c10, %c0_43] : memref<16x128xf32, #tpu.memory_space<vmem>>, vector<1x128xf32>
    tpu.vector_store %arg22[%c10, %c0_43], %42 {strides = array<i32>} : memref<16x128xf32, #tpu.memory_space<vmem>>, vector<1x128xf32>,
    %c1_44 = arith.constant 1 : index
    %c3_45 = arith.constant 3 : index
    %44 = memref.load %arg1[%c1_44, %c3_45] : memref<2x8xi32, #tpu.memory_space<smem>>
    %45 = arith.index_cast %44 : i32 to index
    %c0_46 = arith.constant 0 : index
    %46 = vector.load %arg3[%45, %c0_46] : memref<1000x128xf32, #tpu.memory_space<vmem>>, vector<1x128xf32>
    %c11 = arith.constant 11 : index
    %c0_47 = arith.constant 0 : index
    %47 = vector.load %arg22[%c11, %c0_47] : memref<16x128xf32, #tpu.memory_space<vmem>>, vector<1x128xf32>
    tpu.vector_store %arg22[%c11, %c0_47], %46 {strides = array<i32>} : memref<16x128xf32, #tpu.memory_space<vmem>>, vector<1x128xf32>,
    %c1_48 = arith.constant 1 : index
    %c4_49 = arith.constant 4 : index
    %48 = memref.load %arg1[%c1_48, %c4_49] : memref<2x8xi32, #tpu.memory_space<smem>>
    %49 = arith.index_cast %48 : i32 to index
    %c0_50 = arith.constant 0 : index
    %50 = vector.load %arg3[%49, %c0_50] : memref<1000x128xf32, #tpu.memory_space<vmem>>, vector<1x128xf32>
    %c12 = arith.constant 12 : index
    %c0_51 = arith.constant 0 : index
    %51 = vector.load %arg22[%c12, %c0_51] : memref<16x128xf32, #tpu.memory_space<vmem>>, vector<1x128xf32>
    tpu.vector_store %arg22[%c12, %c0_51], %50 {strides = array<i32>} : memref<16x128xf32, #tpu.memory_space<vmem>>, vector<1x128xf32>,
    %c1_52 = arith.constant 1 : index
    %c5_53 = arith.constant 5 : index
    %52 = memref.load %arg1[%c1_52, %c5_53] : memref<2x8xi32, #tpu.memory_space<smem>>
    %53 = arith.index_cast %52 : i32 to index
    %c0_54 = arith.constant 0 : index
    %54 = vector.load %arg3[%53, %c0_54] : memref<1000x128xf32, #tpu.memory_space<vmem>>, vector<1x128xf32>
    %c13 = arith.constant 13 : index
    %c0_55 = arith.constant 0 : index
    %55 = vector.load %arg22[%c13, %c0_55] : memref<16x128xf32, #tpu.memory_space<vmem>>, vector<1x128xf32>
    tpu.vector_store %arg22[%c13, %c0_55], %54 {strides = array<i32>} : memref<16x128xf32, #tpu.memory_space<vmem>>, vector<1x128xf32>,
    %c1_56 = arith.constant 1 : index
    %c6_57 = arith.constant 6 : index
    %56 = memref.load %arg1[%c1_56, %c6_57] : memref<2x8xi32, #tpu.memory_space<smem>>
    %57 = arith.index_cast %56 : i32 to index
    %c0_58 = arith.constant 0 : index
    %58 = vector.load %arg3[%57, %c0_58] : memref<1000x128xf32, #tpu.memory_space<vmem>>, vector<1x128xf32>
    %c14 = arith.constant 14 : index
    %c0_59 = arith.constant 0 : index
    %59 = vector.load %arg22[%c14, %c0_59] : memref<16x128xf32, #tpu.memory_space<vmem>>, vector<1x128xf32>
    tpu.vector_store %arg22[%c14, %c0_59], %58 {strides = array<i32>} : memref<16x128xf32, #tpu.memory_space<vmem>>, vector<1x128xf32>,
    %c1_60 = arith.constant 1 : index
    %c7_61 = arith.constant 7 : index
    %60 = memref.load %arg1[%c1_60, %c7_61] : memref<2x8xi32, #tpu.memory_space<smem>>
    %61 = arith.index_cast %60 : i32 to index
    %c0_62 = arith.constant 0 : index
    %62 = vector.load %arg3[%61, %c0_62] : memref<1000x128xf32, #tpu.memory_space<vmem>>, vector<1x128xf32>
    %c15 = arith.constant 15 : index
    %c0_63 = arith.constant 0 : index
    %63 = vector.load %arg22[%c15, %c0_63] : memref<16x128xf32, #tpu.memory_space<vmem>>, vector<1x128xf32>
    tpu.vector_store %arg22[%c15, %c0_63], %62 {strides = array<i32>} : memref<16x128xf32, #tpu.memory_space<vmem>>, vector<1x128xf32>,
    %c0_64 = arith.constant 0 : index
    %c0_65 = arith.constant 0 : index
    %64 = vector.load %arg22[%c0_64, %c0_65] : memref<16x128xf32, #tpu.memory_space<vmem>>, vector<16x128xf32>
    %65 = vector.shape_cast %64 : vector<16x128xf32> to vector<2x8x128xf32>
    %c0_66 = arith.constant 0 : index
    %c0_67 = arith.constant 0 : index
    %66 = vector.load %arg4[%c0_66, %c0_67] : memref<8x128xf32, #tpu.memory_space<vmem>>, vector<8x128xf32>
    %67 = vector.shape_cast %66 : vector<8x128xf32> to vector<1x8x128xf32>
    %68 = vector.broadcast %67 : vector<1x8x128xf32> to vector<2x8x128xf32>
    %69 = arith.addf %65, %68 : vector<2x8x128xf32>
    %70 = vector.shape_cast %69 : vector<2x8x128xf32> to vector<16x128xf32>
    %71 = arith.truncf %70 : vector<16x128xf32> to vector<16x128xbf16>
    %c0_68 = arith.constant 0 : index
    %c0_69 = arith.constant 0 : index
    %72 = vector.load %arg5[%c0_68, %c0_69] : memref<128x384xbf16, #tpu.memory_space<vmem>>, vector<128x384xbf16>
    %cst = arith.constant dense<0.000000e+00> : vector<16x384xf32>
    %73 = tpu.matmul %71, %72, %cst {dimension_numbers = #tpu.dot_dimension_numbers<[1], [0], [0], [1], [0, 0, 1, 1], [], []>} : vector<16x128xbf16>, vector<128x384xbf16>, vector<16x384xf32> -> vector<16x384xf32>
    %c0_70 = arith.constant 0 : index
    %c0_71 = arith.constant 0 : index
    %74 = vector.load %arg6[%c0_70, %c0_71] : memref<1x384xf32, #tpu.memory_space<vmem>>, vector<1x384xf32>
    %75 = vector.broadcast %74 : vector<1x384xf32> to vector<16x384xf32>
    %76 = arith.addf %73, %75 : vector<16x384xf32>
    %77 = vector.extract_strided_slice %76 {offsets = [0, 0], sizes = [16, 128], strides = [1, 1]} : vector<16x384xf32> to vector<16x128xf32>
    %78 = vector.shape_cast %77 : vector<16x128xf32> to vector<2x8x128xf32>
    %79 = arith.truncf %78 : vector<2x8x128xf32> to vector<2x8x128xbf16>
    %80 = vector.extract_strided_slice %76 {offsets = [0, 128], sizes = [16, 128], strides = [1, 1]} : vector<16x384xf32> to vector<16x128xf32>
    %81 = vector.shape_cast %80 : vector<16x128xf32> to vector<2x8x128xf32>
    %82 = arith.truncf %81 : vector<2x8x128xf32> to vector<2x8x128xbf16>
    %83 = vector.extract_strided_slice %76 {offsets = [0, 256], sizes = [16, 128], strides = [1, 1]} : vector<16x384xf32> to vector<16x128xf32>
    %84 = vector.shape_cast %83 : vector<16x128xf32> to vector<2x8x128xf32>
    %85 = arith.truncf %84 : vector<2x8x128xf32> to vector<2x8x128xbf16>
    %c0_72 = arith.constant 0 : index
    %c0_73 = arith.constant 0 : index
    %86 = vector.load %arg2[%c0_72, %c0_73] : memref<2x8xf32, #tpu.memory_space<vmem>>, vector<2x8xf32>
    %cst_74 = arith.constant 1.000000e+00 : f32
    %87 = vector.broadcast %cst_74 : f32 to vector<2x8xf32>
    %88 = arith.subf %87, %86 : vector<2x8xf32>
    %89 = vector.shape_cast %88 : vector<2x8xf32> to vector<2x1x8xf32>
    %cst_75 = arith.constant -1.000000e+09 : f32
    %90 = vector.broadcast %cst_75 : f32 to vector<2x1x8xf32>
    %91 = arith.mulf %89, %90 : vector<2x1x8xf32>
    "tpu.trace_start"() <{level = 10 : i32, message = "bqd,bkd->bqk"}> : () -> ()
    %cst_76 = arith.constant dense<0.000000e+00> : vector<2x8x8xf32>
    %92 = tpu.matmul %79, %82, %cst_76 {dimension_numbers = #tpu.dot_dimension_numbers<[2], [2], [1], [1], [0, 0, 0, 1, 1, 1], [0], [0]>} : vector<2x8x128xbf16>, vector<2x8x128xbf16>, vector<2x8x8xf32> -> vector<2x8x8xf32>
    "tpu.trace_stop"() : () -> ()
    %cst_77 = arith.constant 0.0883883461 : f32
    %93 = vector.broadcast %cst_77 : f32 to vector<2x8x8xf32>
    %94 = arith.mulf %92, %93 : vector<2x8x8xf32>
    %95 = vector.broadcast %91 : vector<2x1x8xf32> to vector<2x8x8xf32>
    %96 = arith.addf %94, %95 : vector<2x8x8xf32>
    %cst_78 = arith.constant dense<0xFF800000> : vector<2x8xf32>
    %97 = vector.multi_reduction <maximumf>, %96, %cst_78 [2] : vector<2x8x8xf32> to vector<2x8xf32>
    %98 = vector.shape_cast %97 : vector<2x8xf32> to vector<2x8x1xf32>
    %99 = vector.broadcast %98 : vector<2x8x1xf32> to vector<2x8x8xf32>
    %100 = arith.subf %96, %99 : vector<2x8x8xf32>
    %101 = math.exp %100 : vector<2x8x8xf32>
    %cst_79 = arith.constant dense<0.000000e+00> : vector<2x8xf32>
    %102 = vector.multi_reduction <add>, %101, %cst_79 [2] : vector<2x8x8xf32> to vector<2x8xf32>
    %103 = vector.shape_cast %102 : vector<2x8xf32> to vector<2x8x1xf32>
    %104 = tpu.reciprocal %103 {approx = true} : vector<2x8x1xf32> -> vector<2x8x1xf32>
    %105 = vector.broadcast %104 : vector<2x8x1xf32> to vector<2x8x8xf32>
    %106 = arith.mulf %101, %105 : vector<2x8x8xf32>
    %107 = arith.truncf %106 : vector<2x8x8xf32> to vector<2x8x8xbf16>
    "tpu.trace_start"() <{level = 10 : i32, message = "bqk,bkd->bqd"}> : () -> ()
    %cst_80 = arith.constant dense<0.000000e+00> : vector<2x8x128xf32>
    %108 = tpu.matmul %107, %85, %cst_80 {dimension_numbers = #tpu.dot_dimension_numbers<[2], [1], [1], [2], [0, 0, 0, 1, 1, 2], [0], [0]>} : vector<2x8x8xbf16>, vector<2x8x128xbf16>, vector<2x8x128xf32> -> vector<2x8x128xf32>
    "tpu.trace_stop"() : () -> ()
    %109 = vector.shape_cast %108 : vector<2x8x128xf32> to vector<16x128xf32>
    %110 = arith.truncf %109 : vector<16x128xf32> to vector<16x128xbf16>
    %c0_81 = arith.constant 0 : index
    %c0_82 = arith.constant 0 : index
    %111 = vector.load %arg7[%c0_81, %c0_82] : memref<128x128xbf16, #tpu.memory_space<vmem>>, vector<128x128xbf16>
    %cst_83 = arith.constant dense<0.000000e+00> : vector<16x128xf32>
    %112 = tpu.matmul %110, %111, %cst_83 {dimension_numbers = #tpu.dot_dimension_numbers<[1], [0], [0], [1], [0, 0, 1, 1], [], []>} : vector<16x128xbf16>, vector<128x128xbf16>, vector<16x128xf32> -> vector<16x128xf32>
    %c0_84 = arith.constant 0 : index
    %c0_85 = arith.constant 0 : index
    %113 = vector.load %arg8[%c0_84, %c0_85] : memref<1x128xf32, #tpu.memory_space<vmem>>, vector<1x128xf32>
    %114 = vector.broadcast %113 : vector<1x128xf32> to vector<16x128xf32>
    %115 = arith.addf %112, %114 : vector<16x128xf32>
    %116 = arith.addf %70, %115 : vector<16x128xf32>
    %cst_86 = arith.constant dense<0.000000e+00> : vector<16xf32>
    %117 = vector.multi_reduction <add>, %116, %cst_86 [1] : vector<16x128xf32> to vector<16xf32>
    %118 = vector.shape_cast %117 : vector<16xf32> to vector<16x1xf32>
    %cst_87 = arith.constant 1.280000e+02 : f32
    %119 = vector.broadcast %cst_87 : f32 to vector<16x1xf32>
    %120 = arith.divf %118, %119 : vector<16x1xf32>
    %121 = vector.broadcast %120 : vector<16x1xf32> to vector<16x128xf32>
    %122 = arith.subf %116, %121 : vector<16x128xf32>
    %123 = arith.mulf %122, %122 : vector<16x128xf32>
    %cst_88 = arith.constant dense<0.000000e+00> : vector<16xf32>
    %124 = vector.multi_reduction <add>, %123, %cst_88 [1] : vector<16x128xf32> to vector<16xf32>
    %125 = vector.shape_cast %124 : vector<16xf32> to vector<16x1xf32>
    %cst_89 = arith.constant 1.280000e+02 : f32
    %126 = vector.broadcast %cst_89 : f32 to vector<16x1xf32>
    %127 = arith.divf %125, %126 : vector<16x1xf32>
    %128 = vector.broadcast %120 : vector<16x1xf32> to vector<16x128xf32>
    %129 = arith.subf %116, %128 : vector<16x128xf32>
    %cst_90 = arith.constant 9.99999974E-6 : f32
    %130 = vector.broadcast %cst_90 : f32 to vector<16x1xf32>
    %131 = arith.addf %127, %130 : vector<16x1xf32>
    %132 = math.rsqrt %131 : vector<16x1xf32>
    %133 = vector.broadcast %132 : vector<16x1xf32> to vector<16x128xf32>
    %134 = arith.mulf %129, %133 : vector<16x128xf32>
    %c0_91 = arith.constant 0 : index
    %c0_92 = arith.constant 0 : index
    %135 = vector.load %arg9[%c0_91, %c0_92] : memref<1x128xf32, #tpu.memory_space<vmem>>, vector<1x128xf32>
    %136 = vector.broadcast %135 : vector<1x128xf32> to vector<16x128xf32>
    %137 = arith.mulf %134, %136 : vector<16x128xf32>
    %c0_93 = arith.constant 0 : index
    %c0_94 = arith.constant 0 : index
    %138 = vector.load %arg10[%c0_93, %c0_94] : memref<1x128xf32, #tpu.memory_space<vmem>>, vector<1x128xf32>
    %139 = vector.broadcast %138 : vector<1x128xf32> to vector<16x128xf32>
    %140 = arith.addf %137, %139 : vector<16x128xf32>
    %141 = arith.truncf %140 : vector<16x128xf32> to vector<16x128xbf16>
    %c0_95 = arith.constant 0 : index
    %c0_96 = arith.constant 0 : index
    %142 = vector.load %arg11[%c0_95, %c0_96] : memref<128x256xbf16, #tpu.memory_space<vmem>>, vector<128x256xbf16>
    %cst_97 = arith.constant dense<0.000000e+00> : vector<16x256xf32>
    %143 = tpu.matmul %141, %142, %cst_97 {dimension_numbers = #tpu.dot_dimension_numbers<[1], [0], [0], [1], [0, 0, 1, 1], [], []>} : vector<16x128xbf16>, vector<128x256xbf16>, vector<16x256xf32> -> vector<16x256xf32>
    %c0_98 = arith.constant 0 : index
    %c0_99 = arith.constant 0 : index
    %144 = vector.load %arg12[%c0_98, %c0_99] : memref<1x256xf32, #tpu.memory_space<vmem>>, vector<1x256xf32>
    %145 = vector.broadcast %144 : vector<1x256xf32> to vector<16x256xf32>
    %146 = arith.addf %143, %145 : vector<16x256xf32>
    %147 = arith.mulf %146, %146 : vector<16x256xf32>
    %148 = arith.mulf %146, %147 : vector<16x256xf32>
    %cst_100 = arith.constant 4.471500e-02 : f32
    %149 = vector.broadcast %cst_100 : f32 to vector<16x256xf32>
    %150 = arith.mulf %149, %148 : vector<16x256xf32>
    %151 = arith.addf %146, %150 : vector<16x256xf32>
    %cst_101 = arith.constant 0.797884583 : f32
    %152 = vector.broadcast %cst_101 : f32 to vector<16x256xf32>
    %153 = arith.mulf %152, %151 : vector<16x256xf32>
    %154 = math.tanh %153 : vector<16x256xf32>
    %cst_102 = arith.constant 1.000000e+00 : f32
    %155 = vector.broadcast %cst_102 : f32 to vector<16x256xf32>
    %156 = arith.addf %155, %154 : vector<16x256xf32>
    %cst_103 = arith.constant 5.000000e-01 : f32
    %157 = vector.broadcast %cst_103 : f32 to vector<16x256xf32>
    %158 = arith.mulf %157, %156 : vector<16x256xf32>
    %159 = arith.mulf %146, %158 : vector<16x256xf32>
    %160 = arith.truncf %159 : vector<16x256xf32> to vector<16x256xbf16>
    %c0_104 = arith.constant 0 : index
    %c0_105 = arith.constant 0 : index
    %161 = vector.load %arg13[%c0_104, %c0_105] : memref<256x128xbf16, #tpu.memory_space<vmem>>, vector<256x128xbf16>
    %cst_106 = arith.constant dense<0.000000e+00> : vector<16x128xf32>
    %162 = tpu.matmul %160, %161, %cst_106 {dimension_numbers = #tpu.dot_dimension_numbers<[1], [0], [0], [1], [0, 0, 1, 1], [], []>} : vector<16x256xbf16>, vector<256x128xbf16>, vector<16x128xf32> -> vector<16x128xf32>
    %c0_107 = arith.constant 0 : index
    %c0_108 = arith.constant 0 : index
    %163 = vector.load %arg14[%c0_107, %c0_108] : memref<1x128xf32, #tpu.memory_space<vmem>>, vector<1x128xf32>
    %164 = vector.broadcast %163 : vector<1x128xf32> to vector<16x128xf32>
    %165 = arith.addf %162, %164 : vector<16x128xf32>
    %166 = arith.addf %140, %165 : vector<16x128xf32>
    %cst_109 = arith.constant dense<0.000000e+00> : vector<16xf32>
    %167 = vector.multi_reduction <add>, %166, %cst_109 [1] : vector<16x128xf32> to vector<16xf32>
    %168 = vector.shape_cast %167 : vector<16xf32> to vector<16x1xf32>
    %cst_110 = arith.constant 1.280000e+02 : f32
    %169 = vector.broadcast %cst_110 : f32 to vector<16x1xf32>
    %170 = arith.divf %168, %169 : vector<16x1xf32>
    %171 = vector.broadcast %170 : vector<16x1xf32> to vector<16x128xf32>
    %172 = arith.subf %166, %171 : vector<16x128xf32>
    %173 = arith.mulf %172, %172 : vector<16x128xf32>
    %cst_111 = arith.constant dense<0.000000e+00> : vector<16xf32>
    %174 = vector.multi_reduction <add>, %173, %cst_111 [1] : vector<16x128xf32> to vector<16xf32>
    %175 = vector.shape_cast %174 : vector<16xf32> to vector<16x1xf32>
    %cst_112 = arith.constant 1.280000e+02 : f32
    %176 = vector.broadcast %cst_112 : f32 to vector<16x1xf32>
    %177 = arith.divf %175, %176 : vector<16x1xf32>
    %178 = vector.broadcast %170 : vector<16x1xf32> to vector<16x128xf32>
    %179 = arith.subf %166, %178 : vector<16x128xf32>
    %cst_113 = arith.constant 9.99999974E-6 : f32
    %180 = vector.broadcast %cst_113 : f32 to vector<16x1xf32>
    %181 = arith.addf %177, %180 : vector<16x1xf32>
    %182 = math.rsqrt %181 : vector<16x1xf32>
    %183 = vector.broadcast %182 : vector<16x1xf32> to vector<16x128xf32>
    %184 = arith.mulf %179, %183 : vector<16x128xf32>
    %c0_114 = arith.constant 0 : index
    %c0_115 = arith.constant 0 : index
    %185 = vector.load %arg15[%c0_114, %c0_115] : memref<1x128xf32, #tpu.memory_space<vmem>>, vector<1x128xf32>
    %186 = vector.broadcast %185 : vector<1x128xf32> to vector<16x128xf32>
    %187 = arith.mulf %184, %186 : vector<16x128xf32>
    %c0_116 = arith.constant 0 : index
    %c0_117 = arith.constant 0 : index
    %188 = vector.load %arg16[%c0_116, %c0_117] : memref<1x128xf32, #tpu.memory_space<vmem>>, vector<1x128xf32>
    %189 = vector.broadcast %188 : vector<1x128xf32> to vector<16x128xf32>
    %190 = arith.addf %187, %189 : vector<16x128xf32>
    %191 = vector.shape_cast %190 : vector<16x128xf32> to vector<2x8x128xf32>
    %192 = vector.extract_strided_slice %191 {offsets = [0, 0, 0], sizes = [2, 1, 128], strides = [1, 1, 1]} : vector<2x8x128xf32> to vector<2x1x128xf32>
    %193 = vector.shape_cast %192 : vector<2x1x128xf32> to vector<2x128xf32>
    %194 = arith.truncf %193 : vector<2x128xf32> to vector<2x128xbf16>
    %c0_118 = arith.constant 0 : index
    %c0_119 = arith.constant 0 : index
    %195 = vector.load %arg17[%c0_118, %c0_119] : memref<128x512xbf16, #tpu.memory_space<vmem>>, vector<128x512xbf16>
    %cst_120 = arith.constant dense<0.000000e+00> : vector<2x512xf32>
    %196 = tpu.matmul %194, %195, %cst_120 {dimension_numbers = #tpu.dot_dimension_numbers<[1], [0], [0], [1], [0, 0, 1, 1], [], []>} : vector<2x128xbf16>, vector<128x512xbf16>, vector<2x512xf32> -> vector<2x512xf32>
    %c0_121 = arith.constant 0 : index
    %c0_122 = arith.constant 0 : index
    %197 = vector.load %arg18[%c0_121, %c0_122] : memref<1x512xf32, #tpu.memory_space<vmem>>, vector<1x512xf32>
    %198 = vector.broadcast %197 : vector<1x512xf32> to vector<2x512xf32>
    %199 = arith.addf %196, %198 : vector<2x512xf32>
    %cst_123 = arith.constant 0.000000e+00 : f32
    %200 = vector.broadcast %cst_123 : f32 to vector<2x512xf32>
    %201 = arith.maximumf %199, %200 : vector<2x512xf32>
    %202 = arith.truncf %201 : vector<2x512xf32> to vector<2x512xbf16>
    %c0_124 = arith.constant 0 : index
    %c0_125 = arith.constant 0 : index
    %203 = vector.load %arg19[%c0_124, %c0_125] : memref<512x128xbf16, #tpu.memory_space<vmem>>, vector<512x128xbf16>
    %cst_126 = arith.constant dense<0.000000e+00> : vector<2x128xf32>
    %204 = tpu.matmul %202, %203, %cst_126 {dimension_numbers = #tpu.dot_dimension_numbers<[1], [0], [0], [1], [0, 0, 1, 1], [], []>} : vector<2x512xbf16>, vector<512x128xbf16>, vector<2x128xf32> -> vector<2x128xf32>
    %c0_127 = arith.constant 0 : index
    %c0_128 = arith.constant 0 : index
    %205 = vector.load %arg20[%c0_127, %c0_128] : memref<1x128xf32, #tpu.memory_space<vmem>>, vector<1x128xf32>
    %206 = vector.broadcast %205 : vector<1x128xf32> to vector<2x128xf32>
    %207 = arith.addf %204, %206 : vector<2x128xf32>
    %208 = arith.negf %207 : vector<2x128xf32>
    %209 = math.exp %208 : vector<2x128xf32>
    %cst_129 = arith.constant 1.000000e+00 : f32
    %210 = vector.broadcast %cst_129 : f32 to vector<2x128xf32>
    %211 = arith.addf %210, %209 : vector<2x128xf32>
    %212 = arith.divf %210, %211 : vector<2x128xf32>
    %c0_130 = arith.constant 0 : index
    %c0_131 = arith.constant 0 : index
    %213 = vector.load %arg21[%c0_130, %c0_131] : memref<2x128xf32, #tpu.memory_space<vmem>>, vector<2x128xf32>
    tpu.vector_store %arg21[%c0_130, %c0_131], %212 {strides = array<i32>} : memref<2x128xf32, #tpu.memory_space<vmem>>, vector<2x128xf32>,
    return
  }
  func.func @transform_0(%arg0: i32, %arg1: memref<2x8xi32, #tpu.memory_space<smem>>) -> (i32, i32) {
    %c0_i32 = arith.constant 0 : i32
    %c0_i32_0 = arith.constant 0 : i32
    %c0_i32_1 = arith.constant 0 : i32
    return %c0_i32, %c0_i32_0 : i32, i32
  }
  func.func @transform_1(%arg0: i32, %arg1: memref<2x8xi32, #tpu.memory_space<smem>>) -> (i32, i32) {
    %c0_i32 = arith.constant 0 : i32
    %c0_i32_0 = arith.constant 0 : i32
    %c0_i32_1 = arith.constant 0 : i32
    return %c0_i32, %c0_i32_0 : i32, i32
  }
  func.func @transform_2(%arg0: i32, %arg1: memref<2x8xi32, #tpu.memory_space<smem>>) -> (i32, i32) {
    %c0_i32 = arith.constant 0 : i32
    %c0_i32_0 = arith.constant 0 : i32
    %c0_i32_1 = arith.constant 0 : i32
    return %c0_i32, %c0_i32_0 : i32, i32
  }
  func.func @transform_3(%arg0: i32, %arg1: memref<2x8xi32, #tpu.memory_space<smem>>) -> (i32, i32) {
    %c0_i32 = arith.constant 0 : i32
    %c0_i32_0 = arith.constant 0 : i32
    %c0_i32_1 = arith.constant 0 : i32
    return %c0_i32, %c0_i32_0 : i32, i32
  }
  func.func @transform_4(%arg0: i32, %arg1: memref<2x8xi32, #tpu.memory_space<smem>>) -> (i32, i32) {
    %c0_i32 = arith.constant 0 : i32
    %c0_i32_0 = arith.constant 0 : i32
    %c0_i32_1 = arith.constant 0 : i32
    return %c0_i32, %c0_i32_0 : i32, i32
  }
  func.func @transform_5(%arg0: i32, %arg1: memref<2x8xi32, #tpu.memory_space<smem>>) -> (i32, i32) {
    %c0_i32 = arith.constant 0 : i32
    %c0_i32_0 = arith.constant 0 : i32
    %c0_i32_1 = arith.constant 0 : i32
    return %c0_i32, %c0_i32_0 : i32, i32
  }
  func.func @transform_6(%arg0: i32, %arg1: memref<2x8xi32, #tpu.memory_space<smem>>) -> (i32, i32) {
    %c0_i32 = arith.constant 0 : i32
    %c0_i32_0 = arith.constant 0 : i32
    %c0_i32_1 = arith.constant 0 : i32
    return %c0_i32, %c0_i32_0 : i32, i32
  }
  func.func @transform_7(%arg0: i32, %arg1: memref<2x8xi32, #tpu.memory_space<smem>>) -> (i32, i32) {
    %c0_i32 = arith.constant 0 : i32
    %c0_i32_0 = arith.constant 0 : i32
    %c0_i32_1 = arith.constant 0 : i32
    return %c0_i32, %c0_i32_0 : i32, i32
  }
  func.func @transform_8(%arg0: i32, %arg1: memref<2x8xi32, #tpu.memory_space<smem>>) -> (i32, i32) {
    %c0_i32 = arith.constant 0 : i32
    %c0_i32_0 = arith.constant 0 : i32
    %c0_i32_1 = arith.constant 0 : i32
    return %c0_i32, %c0_i32_0 : i32, i32
  }
  func.func @transform_9(%arg0: i32, %arg1: memref<2x8xi32, #tpu.memory_space<smem>>) -> (i32, i32) {
    %c0_i32 = arith.constant 0 : i32
    %c0_i32_0 = arith.constant 0 : i32
    %c0_i32_1 = arith.constant 0 : i32
    return %c0_i32, %c0_i32_0 : i32, i32
  }
  func.func @transform_10(%arg0: i32, %arg1: memref<2x8xi32, #tpu.memory_space<smem>>) -> (i32, i32) {
    %c0_i32 = arith.constant 0 : i32
    %c0_i32_0 = arith.constant 0 : i32
    %c0_i32_1 = arith.constant 0 : i32
    return %c0_i32, %c0_i32_0 : i32, i32
  }
  func.func @transform_11(%arg0: i32, %arg1: memref<2x8xi32, #tpu.memory_space<smem>>) -> (i32, i32) {
    %c0_i32 = arith.constant 0 : i32
    %c0_i32_0 = arith.constant 0 : i32
    %c0_i32_1 = arith.constant 0 : i32
    return %c0_i32, %c0_i32_0 : i32, i32
  }
  func.func @transform_12(%arg0: i32, %arg1: memref<2x8xi32, #tpu.memory_space<smem>>) -> (i32, i32) {
    %c0_i32 = arith.constant 0 : i32
    %c0_i32_0 = arith.constant 0 : i32
    %c0_i32_1 = arith.constant 0 : i32
    return %c0_i32, %c0_i32_0 : i32, i32
  }
  func.func @transform_13(%arg0: i32, %arg1: memref<2x8xi32, #tpu.memory_space<smem>>) -> (i32, i32) {
    %c0_i32 = arith.constant 0 : i32
    %c0_i32_0 = arith.constant 0 : i32
    %c0_i32_1 = arith.constant 0 : i32
    return %c0_i32, %c0_i32_0 : i32, i32
  }
  func.func @transform_14(%arg0: i32, %arg1: memref<2x8xi32, #tpu.memory_space<smem>>) -> (i32, i32) {
    %c0_i32 = arith.constant 0 : i32
    %c0_i32_0 = arith.constant 0 : i32
    %c0_i32_1 = arith.constant 0 : i32
    return %c0_i32, %c0_i32_0 : i32, i32
  }
  func.func @transform_15(%arg0: i32, %arg1: memref<2x8xi32, #tpu.memory_space<smem>>) -> (i32, i32) {
    %c0_i32 = arith.constant 0 : i32
    %c0_i32_0 = arith.constant 0 : i32
    %c0_i32_1 = arith.constant 0 : i32
    return %c0_i32, %c0_i32_0 : i32, i32
  }
  func.func @transform_16(%arg0: i32, %arg1: memref<2x8xi32, #tpu.memory_space<smem>>) -> (i32, i32) {
    %c0_i32 = arith.constant 0 : i32
    %c0_i32_0 = arith.constant 0 : i32
    %c0_i32_1 = arith.constant 0 : i32
    return %c0_i32, %c0_i32_0 : i32, i32
  }
  func.func @transform_17(%arg0: i32, %arg1: memref<2x8xi32, #tpu.memory_space<smem>>) -> (i32, i32) {
    %c0_i32 = arith.constant 0 : i32
    %c0_i32_0 = arith.constant 0 : i32
    %c0_i32_1 = arith.constant 0 : i32
    return %c0_i32, %c0_i32_0 : i32, i32
  }
  func.func @transform_18(%arg0: i32, %arg1: memref<2x8xi32, #tpu.memory_space<smem>>) -> (i32, i32) {
    %c0_i32 = arith.constant 0 : i32
    %c0_i32_0 = arith.constant 0 : i32
    %c0_i32_1 = arith.constant 0 : i32
    return %c0_i32, %c0_i32_0 : i32, i32
  }
  func.func @transform_19(%arg0: i32, %arg1: memref<2x8xi32, #tpu.memory_space<smem>>) -> (i32, i32) {
    %c0_i32 = arith.constant 0 : i32
    %c0_i32_0 = arith.constant 0 : i32
    %c0_i32_1 = arith.constant 0 : i32
    return %c0_i32, %c0_i32_0 : i32, i32
  }
}

</mosaic_0001>

<bundles_post_ra>
// kernel: tpu_custom_call.1
= control target key start
LH: loop header
LB: loop body
LE: loop exit
PB: predicated region body
PF: predicated region fallthrough
CT: control target
= control target key end

     0   :  { %s3192_s0 = inlined_call_operand.hbm [shape: s32[2,8], index: 0, kind: input, shape index: {}]   ;;  %s3193_s1 = inlined_call_operand.hbm [shape: f32[2,8], index: 1, kind: input, shape index: {}]   ;;  %s3194_s2 = inlined_call_operand.hbm [shape: f32[1000,128], index: 2, kind: input, shape index: {}]   ;;  %s3195_s3 = inlined_call_operand.vmem [shape: f32[8,128], index: 3, kind: input, shape index: {}]   ;;  %s3196_s4 = inlined_call_operand.hbm [shape: bf16[128,384], index: 4, kind: input, shape index: {}]   ;;  %s3197_s5 = inlined_call_operand.vmem [shape: f32[1,384], index: 5, kind: input, shape index: {}]   ;;  %s3198_s6 = inlined_call_operand.hbm [shape: bf16[128,128], index: 6, kind: input, shape index: {}]   ;;  %s3199_s7 = inlined_call_operand.vmem [shape: f32[1,128], index: 7, kind: input, shape index: {}]   ;;  %s3200_s8 = inlined_call_operand.vmem [shape: f32[1,128], index: 8, kind: input, shape index: {}]   ;;  %s3201_s9 = inlined_call_operand.vmem [shape: f32[1,128], index: 9, kind: input, shape index: {}]   ;;  %s3202_s10 = inlined_call_operand.hbm [shape: bf16[128,256], index: 10, kind: input, shape index: {}]   ;;  %s3203_s11 = inlined_call_operand.vmem [shape: f32[1,256], index: 11, kind: input, shape index: {}]   ;;  %s3204_s12 = inlined_call_operand.hbm [shape: bf16[256,128], index: 12, kind: input, shape index: {}]   ;;  %s3205_s13 = inlined_call_operand.vmem [shape: f32[1,128], index: 13, kind: input, shape index: {}]   ;;  %s3206_s14 = inlined_call_operand.vmem [shape: f32[1,128], index: 14, kind: input, shape index: {}]   ;;  %s3207_s15 = inlined_call_operand.vmem [shape: f32[1,128], index: 15, kind: input, shape index: {}]   ;;  %s3208_s16 = inlined_call_operand.hbm [shape: bf16[128,512], index: 16, kind: input, shape index: {}]   ;;  %s3209_s17 = inlined_call_operand.vmem [shape: f32[1,512], index: 17, kind: input, shape index: {}]   ;;  %s3210_s18 = inlined_call_operand.hbm [shape: bf16[512,128], index: 18, kind: input, shape index: {}]   ;;  %s3211_s19 = inlined_call_operand.vmem [shape: f32[1,128], index: 19, kind: input, shape index: {}]   ;;  %s3212_s20 = inlined_call_operand.hbm [shape: f32[2,128], index: 20, kind: output, shape index: {}]  }
   0x1   :  { %3220 = sst [smem:[#allocation27_spill]] %s3192_s0 }
   0x2   :  { %3221 = sst [smem:[#allocation28_spill]] %s3193_s1  ;;  %s3226_s23 = sld [smem:[#allocation27_spill]] }
   0x3   :  { %3222 = sst [smem:[#allocation29_spill]] %s3194_s2 }
   0x4   :  { %3223 = sst [smem:[#allocation30_spill]] %s3195_s3 }
   0x5   :  { %3224 = sst [smem:[#allocation31_spill]] %s3196_s4 }
   0x6   :  { %3225 = sst [smem:[#allocation32_spill]] %s3206_s14 }
   0x8   :  { %s2539_s14 = scalar_lea.hbm %s3226_s23, 32 }
   0x9   :  { %p2540_p0 = scmp.ne.s32.totalorder %s3226_s23, %s2539_s14  ;;  %p2543_p1 = scmp.lt.u32.totalorder %s2539_s14, %s3226_s23 }
   0xb   :  { %p2545_p2 = pnand %p2543_p1, %p2540_p0 }
   0xd   :  { %2548 = shalt.err (!%p2545_p2)  }
   0xe   :  { %s2761_s26 = smov [#allocation4]  }
   0xf   :  { %26 = dma.hbm_to_smem %s3226_s23, 32, %s2761_s26, [#allocation3] }
  0x10   :  { %2747 = dma.done.wait [#allocation3], 32 }
  0x11   :  { %2748 = vsyncadd [#allocation3], 4294967264 }
  0x12   :  { %28 = sfence }
  0x13   :  { %29 = vsyncpa [#allocation6], 0 }
  0x14   :  { %30 = vsyncpa [#allocation9], 0 }
  0x15   :  { %31 = vsyncpa [#allocation12], 0 }
  0x16   :  { %32 = vsyncpa [#allocation15], 0 }
  0x17   :  { %33 = vsyncpa [#allocation18], 0 }
  0x18   :  { %34 = vsyncpa [#allocation7], 0  ;;  %s2762_s4 = smov [#allocation8]   ;;  %s3227_s0 = sld [smem:[#allocation29_spill]] }
  0x19   :  { %s50_s29 = sshll.u32 %s2762_s4, 4  ;;  %s51_s29 = int_to_ptr.vmem [resolvable:$true] %s50_s29 }
  0x1e   :  { %s2549_s21 = scalar_lea.hbm %s3227_s0, 16000 }
  0x1f   :  { %p2550_p3 = scmp.ne.s32.totalorder %s3227_s0, %s2549_s21  ;;  %p2553_p4 = scmp.lt.u32.totalorder %s2549_s21, %s3227_s0 }
  0x21   :  { %p2555_p5 = pnand %p2553_p4, %p2550_p3 }
  0x23   :  { %2558 = shalt.err (!%p2555_p5)
}
  0x24   :  { %s2559_s2 = scalar_lea.vmem %s51_s29, 16000  ;;  %p2564_p7 = scmp.lt.s32.totalorder %s51_s29, %s51_s29 }
  0x25   :  { %p2560_p6 = scmp.ne.s32.totalorder %s51_s29, %s2559_s2  ;;  %p2565_p8 = scmp.lt.s32.totalorder %s2559_s2, %s2559_s2 }
  0x27   :  { %p2566_p9 = por %p2565_p8, %p2564_p7 }
  0x29   :  { %p2567_p10 = pnand %p2566_p9, %p2560_p6 }
  0x2b   :  { %2570 = shalt.err (!%p2567_p10)
}
  0x2c   :  { %s3217_s25 = smov 128   ;;  %s3218_s3 = smov 8  }
  0x2d   :  { %56 = dma.hbm_to_vmem [thread:$0]  %s3227_s0, 16000, %s51_s29, [#allocation9], %s3217_s25, %s3217_s25, %s3218_s3  }
  0x2e   :  { %s2765_s28 = smov [#allocation11]   ;;  %s2571_s21 = scalar_lea.hbm %s3198_s6, 1024 }
  0x2f   :  { %s78_s4 = sshll.u32 %s2765_s28, 4  ;;  %p2572_p11 = scmp.ne.s32.totalorder %s3198_s6, %s2571_s21  ;;  %s79_s4 = int_to_ptr.vmem [resolvable:$true] %s78_s4 }
  0x30   :  { %p2575_p12 = scmp.lt.u32.totalorder %s2571_s21, %s3198_s6 }
  0x32   :  { %p2577_p13 = pnand %p2575_p12, %p2572_p11 }
  0x34   :  { %2580 = shalt.err (!%p2577_p13)
}
  0x35   :  { %s2581_s2 = scalar_lea.vmem %s79_s4, 1024  ;;  %p2586_p1 = scmp.lt.s32.totalorder %s79_s4, %s79_s4 }
  0x36   :  { %p2582_p0 = scmp.ne.s32.totalorder %s79_s4, %s2581_s2  ;;  %p2587_p2 = scmp.lt.s32.totalorder %s2581_s2, %s2581_s2 }
  0x38   :  { %p2588_p3 = por %p2587_p2, %p2586_p1 }
  0x3a   :  { %p2589_p4 = pnand %p2588_p3, %p2582_p0 }
  0x3c   :  { %2592 = shalt.err (!%p2589_p4)
}
  0x3d   :  { %s3219_s29 = smov 64   ;;  %s2767_s0 = smov 4  }
  0x3e   :  { %84 = dma.hbm_to_vmem [thread:$0]  %s3198_s6, 1024, %s79_s4, [#allocation12], %s3219_s29, %s3219_s29, %s2767_s0  }
  0x3f   :  { %s2768_s28 = smov [#allocation14]   ;;  %s2769_s30 = smov [#allocation5]  }
  0x40   :  { %s110_s14 = sshll.u32 %s2768_s28, 4  ;;  %s41_s21 = sshll.u32 %s2769_s30, 4  ;;  %s111_s14 = int_to_ptr.vmem [resolvable:$true] %s110_s14  ;;  %s42_s21 = int_to_ptr.vmem [resolvable:$true] %s41_s21 }
  0x41   :  { %s2593_s23 = scalar_lea.hbm %s3204_s12, 2048 }
  0x42   :  { %p2594_p5 = scmp.ne.s32.totalorder %s3204_s12, %s2593_s23  ;;  %p2597_p6 = scmp.lt.u32.totalorder %s2593_s23, %s3204_s12 }
  0x44   :  { %p2599_p7 = pnand %p2597_p6, %p2594_p5 }
  0x46   :  { %2602 = shalt.err (!%p2599_p7)
}
  0x47   :  { %s2603_s6 = scalar_lea.vmem %s111_s14, 2048  ;;  %p2608_p9 = scmp.lt.s32.totalorder %s111_s14, %s111_s14 }
  0x48   :  { %p2604_p8 = scmp.ne.s32.totalorder %s111_s14, %s2603_s6  ;;  %p2609_p10 = scmp.lt.s32.totalorder %s2603_s6, %s2603_s6 }
  0x4a   :  { %p2610_p11 = por %p2609_p10, %p2608_p9 }
  0x4c   :  { %p2611_p12 = pnand %p2610_p11, %p2604_p8 }
  0x4e   :  { %2614 = shalt.err (!%p2611_p12)
}
  0x4f   :  { %116 = dma.hbm_to_vmem [thread:$0]  %s3204_s12, 2048, %s111_s14, [#allocation15], %s3219_s29, %s3219_s29, %s2767_s0  }
  0x50   :  { %s3228_s25 = sld [smem:[#allocation28_spill]] }
  0x56   :  { %s2615_s3 = scalar_lea.hbm %s3228_s25, 32 }
  0x57   :  { %p2616_p13 = scmp.ne.s32.totalorder %s3228_s25, %s2615_s3  ;;  %p2619_p0 = scmp.lt.u32.totalorder %s2615_s3, %s3228_s25 }
  0x59   :  { %p2621_p1 = pnand %p2619_p0, %p2616_p13 }
  0x5b   :  { %2624 = shalt.err (!%p2621_p1)
}
  0x5c   :  { %s2625_s24 = scalar_lea.vmem %s42_s21, 32  ;;  %p2630_p3 = scmp.lt.s32.totalorder %s42_s21, %s42_s21 }
  0x5d   :  { %p2626_p2 = scmp.ne.s32.totalorder %s42_s21, %s2625_s24  ;;  %p2631_p4 = scmp.lt.s32.totalorder %s2625_s24, %s2625_s24 }
  0x5f   :  { %p2632_p5 = por %p2631_p4, %p2630_p3 }
  0x61   :  { %p2633_p6 = pnand %p2632_p5, %p2626_p2 }
  0x63   :  { %2636 = shalt.err (!%p2633_p6)
}
  0x64   :  { %44 = dma.hbm_to_vmem [thread:$0]  %s3228_s25, 32, %s42_s21, [#allocation6]  }
  0x65   :  { %s2770_s2 = smov [#allocation10]   ;;  %s3229_s27 = sld [smem:[#allocation31_spill]] }
  0x66   :  { %s64_s6 = sshll.u32 %s2770_s2, 4  ;;  %s65_s6 = int_to_ptr.vmem [resolvable:$true] %s64_s6 }
  0x6b   :  { %s2637_s28 = scalar_lea.hbm %s3229_s27, 3072 }
  0x6c   :  { %p2638_p7 = scmp.ne.s32.totalorder %s3229_s27, %s2637_s28  ;;  %p2641_p8 = scmp.lt.u32.totalorder %s2637_s28, %s3229_s27 }
  0x6e   :  { %p2643_p9 = pnand %p2641_p8, %p2638_p7 }
  0x70   :  { %2646 = shalt.err (!%p2643_p9)
}
  0x71   :  { %s2647_s23 = scalar_lea.vmem %s65_s6, 3072  ;;  %p2652_p11 = scmp.lt.s32.totalorder %s65_s6, %s65_s6 }
  0x72   :  { %p2648_p10 = scmp.ne.s32.totalorder %s65_s6, %s2647_s23  ;;  %p2653_p12 = scmp.lt.s32.totalorder %s2647_s23, %s2647_s23 }
  0x74   :  { %p2654_p13 = por %p2653_p12, %p2652_p11 }
  0x76   :  { %p2655_p0 = pnand %p2654_p13, %p2648_p10 }
  0x78   :  { %2658 = shalt.err (!%p2655_p0)
}
  0x79   :  { %s2771_s21 = smov 192   ;;  %s2772_s25 = smov 12  }
  0x7a   :  { %70 = dma.hbm_to_vmem [thread:$0]  %s3229_s27, 3072, %s65_s6, [#allocation9], %s2771_s21, %s2771_s21, %s2772_s25  }
  0x7b   :  { %s2773_s14 = smov [#allocation13]   ;;  %s2774_s4 = smov [#allocation16]  }
  0x7c   :  { %s96_s2 = sshll.u32 %s2773_s14, 4  ;;  %s128_s26 = sshll.u32 %s2774_s4, 4  ;;  %s97_s2 = int_to_ptr.vmem [resolvable:$true] %s96_s2  ;;  %s129_s26 = int_to_ptr.vmem [resolvable:$true] %s128_s26 }
  0x7d   :  { %s2659_s30 = scalar_lea.hbm %s3202_s10, 2048 }
  0x7e   :  { %p2660_p1 = scmp.ne.s32.totalorder %s3202_s10, %s2659_s30  ;;  %p2663_p2 = scmp.lt.u32.totalorder %s2659_s30, %s3202_s10 }
  0x80   :  { %p2665_p3 = pnand %p2663_p2, %p2660_p1 }
  0x82   :  { %2668 = shalt.err (!%p2665_p3)
}
  0x83   :  { %s2669_s6 = scalar_lea.vmem %s97_s2, 2048  ;;  %p2674_p5 = scmp.lt.s32.totalorder %s97_s2, %s97_s2 }
  0x84   :  { %p2670_p4 = scmp.ne.s32.totalorder %s97_s2, %s2669_s6  ;;  %p2675_p6 = scmp.lt.s32.totalorder %s2669_s6, %s2669_s6 }
  0x86   :  { %p2676_p7 = por %p2675_p6, %p2674_p5 }
  0x88   :  { %p2677_p8 = pnand %p2676_p7, %p2670_p4 }
  0x8a   :  { %2680 = shalt.err (!%p2677_p8)
}
  0x8b   :  { %s3230_s27 = smov 8   ;;  %s3231_s21 = smov 128  }
  0x8c   :  { %102 = dma.hbm_to_vmem [thread:$0]  %s3202_s10, 2048, %s97_s2, [#allocation12], %s3231_s21, %s3231_s21, %s3230_s27  }
  0x8d   :  { %s2681_s14 = scalar_lea.hbm %s3208_s16, 4096 }
  0x8e   :  { %p2682_p9 = scmp.ne.s32.totalorder %s3208_s16, %s2681_s14  ;;  %p2685_p10 = scmp.lt.u32.totalorder %s2681_s14, %s3208_s16 }
  0x90   :  { %p2687_p11 = pnand %p2685_p10, %p2682_p9 }
  0x92   :  { %2690 = shalt.err (!%p2687_p11)
}
  0x93   :  { %s2691_s1 = scalar_lea.vmem %s129_s26, 4096  ;;  %p2696_p13 = scmp.lt.s32.totalorder %s129_s26, %s129_s26 }
  0x94   :  { %p2692_p12 = scmp.ne.s32.totalorder %s129_s26, %s2691_s1  ;;  %p2697_p0 = scmp.lt.s32.totalorder %s2691_s1, %s2691_s1 }
  0x96   :  { %p2698_p1 = por %p2697_p0, %p2696_p13 }
  0x98   :  { %p2699_p2 = pnand %p2698_p1, %p2692_p12 }
  0x9a   :  { %2702 = shalt.err (!%p2699_p2)
}
  0x9b   :  { %s2775_s10 = smov 256   ;;  %s2776_s2 = smov 16  }
  0x9c   :  { %134 = dma.hbm_to_vmem [thread:$0]  %s3208_s16, 4096, %s129_s26, [#allocation15], %s2775_s10, %s2775_s10, %s2776_s2  }
  0x9d   :  { %s2777_s6 = smov [#allocation17]   ;;  %s2703_s24 = scalar_lea.hbm %s3210_s18, 4096 }
  0x9e   :  { %s142_s27 = sshll.u32 %s2777_s6, 4  ;;  %p2704_p3 = scmp.ne.s32.totalorder %s3210_s18, %s2703_s24  ;;  %s143_s27 = int_to_ptr.vmem [resolvable:$true] %s142_s27 }
  0x9f   :  { %p2707_p4 = scmp.lt.u32.totalorder %s2703_s24, %s3210_s18 }
  0xa1   :  { %p2709_p5 = pnand %p2707_p4, %p2704_p3 }
  0xa3   :  { %2712 = shalt.err (!%p2709_p5)
}
  0xa4   :  { %s2713_s28 = scalar_lea.vmem %s143_s27, 4096  ;;  %p2718_p7 = scmp.lt.s32.totalorder %s143_s27, %s143_s27 }
  0xa5   :  { %p2714_p6 = scmp.ne.s32.totalorder %s143_s27, %s2713_s28  ;;  %p2719_p8 = scmp.lt.s32.totalorder %s2713_s28, %s2713_s28 }
  0xa7   :  { %p2720_p9 = por %p2719_p8, %p2718_p7 }
  0xa9   :  { %p2721_p10 = pnand %p2720_p9, %p2714_p6 }
  0xab   :  { %2724 = shalt.err (!%p2721_p10)
}
  0xac   :  { %s3232_s16 = smov 64  }
  0xad   :  { %148 = dma.hbm_to_vmem [thread:$0]  %s3210_s18, 4096, %s143_s27, [#allocation18], %s3232_s16, %s3232_s16, %s2767_s0  }
  0xae   :  { %2749 = dma.done.wait [#allocation6], 32  }
  0xaf   :  { %2750 = vsyncadd [#allocation6], 4294967264 }
  0xb0   :  { %2751 = dma.done.wait [#allocation9], 19072  }
  0xb1   :  { %2752 = vsyncadd [#allocation9], 4294948224 }
  0xb2   :  { %2753 = dma.done.wait [#allocation12], 3072  }
  0xb3   :  { %2754 = vsyncadd [#allocation12], 4294964224 }
  0xb4   :  { %2755 = dma.done.wait [#allocation15], 6144  }
  0xb5   :  { %2756 = vsyncadd [#allocation15], 4294961152 }
  0xb6   :  { %2757 = dma.done.wait [#allocation18], 4096  }
  0xb7   :  { %2758 = vsyncadd [#allocation18], 4294963200  ;;  %v2778_v0 = vmov 0   ;;  %v2779_v1 = vmov 0.0   ;;  %s3013_s30 = sld [smem:[#allocation4]]  ;;  %s3015_s1 = sld [smem:[#allocation4 + $0x1]]  ;;  %v280_v48 = vlaneseq }
  0xb8   :  { %455 = vmatprep.mubr.bf16.mxu0 %v2778_v0  ;;  %2265 = vmatprep.subr.bf16.mxu1 %v2779_v1  ;;  %s3017_s18 = sld [smem:[#allocation4 + $0x2]]  ;;  %s3019_s0 = sld [smem:[#allocation4 + $0x3]]  ;;  %v2351_v2 = vld [vmem:[#allocation10 + $0x4] ss:$12 sps:$4 sm:$0xff]   ;;  %v2353_v3 = vld [vmem:[#allocation10] ss:$12 sps:$4 sm:$0xff]  }
  0xb9   :  { %s3021_s10 = sld [smem:[#allocation4 + $0x4]]  ;;  %s3023_s2 = sld [smem:[#allocation4 + $0x5]]  ;;  %423 = vmatprep.subr.bf16.mxu0 %v2351_v2  ;;  %v2354_v4 = vld [vmem:[#allocation10 + $0x1c] ss:$12 sps:$4 sm:$0xff]   ;;  %v2356_v5 = vld [vmem:[#allocation10 + $0x18] ss:$12 sps:$4 sm:$0xff]  }
  0xba   :  { %s3025_s22 = sld [smem:[#allocation4 + $0x6]]  ;;  %s3027_s23 = sld [smem:[#allocation4 + $0x7]]  ;;  %424 = vmatpush1.bf16.msra.mxu0 %v2353_v3  ;;  %v2357_v6 = vld [vmem:[#allocation10 + $0x34] ss:$12 sps:$4 sm:$0xff]   ;;  %v2359_v7 = vld [vmem:[#allocation10 + $0x30] ss:$12 sps:$4 sm:$0xff]  }
  0xbb   :  { %s3029_s6 = sld [smem:[#allocation4 + $0x80]]  ;;  %s3031_s27 = sld [smem:[#allocation4 + $0x81]]  ;;  %425 = vmatprep.subr.bf16.mxu0 %v2354_v4  ;;  %v2360_v8 = vld [vmem:[#allocation10 + $0x4c] ss:$12 sps:$4 sm:$0xff]   ;;  %v2362_v9 = vld [vmem:[#allocation10 + $0x48] ss:$12 sps:$4 sm:$0xff]  }
  0xbc   :  { %s3033_s21 = sld [smem:[#allocation4 + $0x82]]  ;;  %s3035_s25 = sld [smem:[#allocation4 + $0x83]]  ;;  %v2363_v10 = vld [vmem:[#allocation10 + $0x64] ss:$12 sps:$4 sm:$0xff]   ;;  %v2365_v18 = vld [vmem:[#allocation10 + $0x60] ss:$12 sps:$4 sm:$0xff]  }
  0xbd   :  { %s3037_s24 = sld [smem:[#allocation4 + $0x84]]  ;;  %s3039_s12 = sld [smem:[#allocation4 + $0x85]]  ;;  %v2366_v22 = vld [vmem:[#allocation10 + $0x7c] ss:$12 sps:$4 sm:$0xff]   ;;  %v2368_v28 = vld [vmem:[#allocation10 + $0x78] ss:$12 sps:$4 sm:$0xff]  }
  0xbe   :  { %426 = vmatpush1.bf16.msra.mxu0 %v2356_v5  ;;  %s177_s29 = scalar_lea.vmem [#allocation8], %s3013_s30  ;;  %s181_s14 = scalar_lea.vmem [#allocation8], %s3015_s1  ;;  %v2375_v27 = vld [vmem:[#allocation10 + $0x8] ss:$12 sps:$4 sm:$0xff]   ;;  %v2376_v29 = vld [vmem:[#allocation10 + $0x20] ss:$12 sps:$4 sm:$0xff]  }
  0xbf   :  { %427 = vmatprep.subr.bf16.mxu0 %v2357_v6  ;;  %v178_v11 = vld [vmem:[%s177_s29] sm:$0x1]  ;;  %s185_s4 = scalar_lea.vmem [#allocation8], %s3017_s18  ;;  %s189_s28 = scalar_lea.vmem [#allocation8], %s3019_s0  ;;  %2266 = vmatpush3.bf16.msra.mxu1 %v2375_v27  ;;  %v2369_v30 = vld [vmem:[#allocation10 + $0x94] ss:$12 sps:$4 sm:$0xff]  }
  0xc0   :  { %179 = vst [vmem:[#allocation2] sm:$0x1] %v178_v11  ;;  %v182_v12 = vld [vmem:[%s181_s14] sm:$0x1]  ;;  %s193_s16 = scalar_lea.vmem [#allocation8], %s3021_s10  ;;  %s197_s26 = scalar_lea.vmem [#allocation8], %s3023_s2  ;;  %2267 = vmatprep.subr.bf16.mxu1 %v2779_v1 }
  0xc1   :  { %v186_v13 = vld [vmem:[%s185_s4] sm:$0x1]  ;;  %183 = vst [vmem:[#allocation2 + $0x1] sm:$0x1] %v182_v12  ;;  %s201_s3 = scalar_lea.vmem [#allocation8], %s3025_s22  ;;  %s205_s30 = scalar_lea.vmem [#allocation8], %s3027_s23 }
  0xc2   :  { %428 = vmatpush1.bf16.msra.mxu0 %v2359_v7  ;;  %v190_v14 = vld [vmem:[%s189_s28] sm:$0x1]  ;;  %187 = vst [vmem:[#allocation2 + $0x2] sm:$0x1] %v186_v13  ;;  %s209_s1 = scalar_lea.vmem [#allocation8], %s3029_s6  ;;  %s213_s18 = scalar_lea.vmem [#allocation8], %s3031_s27 }
  0xc3   :  { %429 = vmatprep.subr.bf16.mxu0 %v2360_v8  ;;  %191 = vst [vmem:[#allocation2 + $0x3] sm:$0x1] %v190_v14  ;;  %v194_v15 = vld [vmem:[%s193_s16] sm:$0x1]  ;;  %s217_s0 = scalar_lea.vmem [#allocation8], %s3033_s21  ;;  %s221_s10 = scalar_lea.vmem [#allocation8], %s3035_s25  ;;  %2268 = vmatpush3.bf16.msra.mxu1 %v2376_v29 }
  0xc4   :  { %v198_v16 = vld [vmem:[%s197_s26] sm:$0x1]  ;;  %195 = vst [vmem:[#allocation2 + $0x4] sm:$0x1] %v194_v15  ;;  %s225_s2 = scalar_lea.vmem [#allocation8], %s3037_s24  ;;  %s2033_s22 = sld [smem:[#allocation4 + $0x86]]  ;;  %2269 = vmatprep.subr.bf16.mxu1 %v2779_v1 }
  0xc5   :  { %v202_v17 = vld [vmem:[%s201_s3] sm:$0x1]  ;;  %199 = vst [vmem:[#allocation2 + $0x5] sm:$0x1] %v198_v16  ;;  %s229_s23 = scalar_lea.vmem [#allocation8], %s3039_s12  ;;  %s2034_s6 = sld [smem:[#allocation4 + $0x87]] }
  0xc6   :  { %203 = vst [vmem:[#allocation2 + $0x6] sm:$0x1] %v202_v17  ;;  %v206_v19 = vld [vmem:[%s205_s30] sm:$0x1]  ;;  %430 = vmatpush1.bf16.msra.mxu0 %v2362_v9  ;;  %v2371_v31 = vld [vmem:[#allocation10 + $0x90] ss:$12 sps:$4 sm:$0xff]  }
  0xc7   :  { %v210_v20 = vld [vmem:[%s209_s1] sm:$0x1]  ;;  %207 = vst [vmem:[#allocation2 + $0x7] sm:$0x1] %v206_v19  ;;  %431 = vmatprep.subr.bf16.mxu0 %v2363_v10  ;;  %v2377_v34 = vld [vmem:[#allocation10 + $0x38] ss:$12 sps:$4 sm:$0xff]  }
  0xc8   :  { %v214_v21 = vld [vmem:[%s213_s18] sm:$0x1]  ;;  %211 = vst [vmem:[#allocation2 + $0x8] sm:$0x1] %v210_v20  ;;  %v2374_v36 = vld [vmem:[#allocation10 + $0xa8] ss:$12 sps:$4 sm:$0xff]   ;;  %2270 = vmatpush3.bf16.msra.mxu1 %v2377_v34 }
  0xc9   :  { %215 = vst [vmem:[#allocation2 + $0x9] sm:$0x1] %v214_v21  ;;  %v218_v23 = vld [vmem:[%s217_s0] sm:$0x1]  ;;  %s3233_s12 = sld [smem:[#allocation30_spill]]  ;;  %2271 = vmatprep.subr.bf16.mxu1 %v2779_v1  ;;  %vm2780_vm0 = vmmov 0  }
  0xca   :  { %v222_v24 = vld [vmem:[%s221_s10] sm:$0x1]  ;;  %219 = vst [vmem:[#allocation2 + $0xa] sm:$0x1] %v218_v23  ;;  %432 = vmatpush1.bf16.msra.mxu0 %v2365_v18  ;;  %s233_s27 = scalar_lea.vmem [#allocation8], %s2033_s22  ;;  %2281 = vmatprep.mubr.msk.bf16.mxu1 %vm2780_vm0, %v2779_v1  ;;  %v3079_v49 = vshrl.u32 %v280_v48, 7 }
  0xcb   :  { %223 = vst [vmem:[#allocation2 + $0xb] sm:$0x1] %v222_v24  ;;  %v226_v25 = vld [vmem:[%s225_s2] sm:$0x1]  ;;  %433 = vmatprep.subr.bf16.mxu0 %v2366_v22  ;;  %s237_s21 = scalar_lea.vmem [#allocation8], %s2034_s6  ;;  %vm666_vm1 = vcmask 1043456  }
  0xcc   :  { %227 = vst [vmem:[#allocation2 + $0xc] sm:$0x1] %v226_v25  ;;  %v230_v26 = vld [vmem:[%s229_s23] sm:$0x1]  ;;  %v2378_v38 = vld [vmem:[#allocation10 + $0x50] ss:$12 sps:$4 sm:$0xff]  }
  0xcd   :  { %231 = vst [vmem:[#allocation2 + $0xd] sm:$0x1] %v230_v26  ;;  %v234_v32 = vld [vmem:[%s233_s27] sm:$0x1]  ;;  %v2379_v40 = vld [vmem:[#allocation10 + $0x68] ss:$12 sps:$4 sm:$0xff]   ;;  %2272 = vmatpush3.bf16.msra.mxu1 %v2378_v38 }
  0xce   :  { %434 = vmatpush1.bf16.msra.mxu0 %v2368_v28  ;;  %235 = vst [vmem:[#allocation2 + $0xe] sm:$0x1] %v234_v32  ;;  %v238_v33 = vld [vmem:[%s237_s21] sm:$0x1]  ;;  %v240_v39 = vld [vmem:[#allocation2] sm:$0xff]  ;;  %2273 = vmatprep.subr.bf16.mxu1 %v2779_v1  ;;  %v3082_v50 = vsub.s32 1, %v3079_v49 }
  0xcf   :  { %435 = vmatprep.subr.bf16.mxu0 %v2369_v30  ;;  %v2372_v35 = vld [vmem:[#allocation10 + $0xac] ss:$12 sps:$4 sm:$0xff]   ;;  %239 = vst [vmem:[#allocation2 + $0xf] sm:$0x1] %v238_v33  ;;  %v2382_v47 = vld [vmem:[#allocation10 + $0xb0] ss:$12 sps:$4 sm:$0xff]  }
  0xd0   :  { %v242_v37 = vld [vmem:[%s3233_s12] sm:$0xff]  ;;  %v2381_v46 = vld [vmem:[#allocation10 + $0x98] ss:$12 sps:$4 sm:$0xff]   ;;  %v3089_v53 = vsub.s32 0, %v3079_v49  ;;  %v290_v5 = vsub.s32 2, %v3079_v49  ;;  %vm638_vm2 = vcmask 64512  }
  0xd1   :  { %v3061_v41 = vadd.f32 %v242_v37, %v240_v39  ;;  %v2380_v44 = vld [vmem:[#allocation10 + $0x80] ss:$12 sps:$4 sm:$0xff]   ;;  %2274 = vmatpush3.bf16.msra.mxu1 %v2379_v40  ;;  %v2781_v17 = vmov 1966171168   ;;  %v513_v20 = vld [vmem:[#allocation5] sm:$0x3] }
  0xd2   :  { %436 = vmatpush1.bf16.msra.mxu0 %v2371_v31  ;;  %2275 = vmatprep.subr.bf16.mxu1 %v2779_v1  ;;  %v278_v51 = vld [vmem:[%s3197_s5] sm:$0x7]  ;;  %v517_v18 = vunpack.c.l.s4 %v2781_v17  ;;  %v514_v21 = vsub.f32 1.0, %v513_v20  ;;  %s3234_s1 = sld [smem:[#allocation32_spill]]  ;;  %vm1381_vm3 = vcmask 1041409   ;;  %s2782_s22 = smov [#allocation19]  }
  0xd3   :  { %437 = vmatprep.subr.bf16.mxu0 %v2372_v35  ;;  %v287_v52 = vrot.slane %v278_v51, %v3082_v50  ;;  %v283_v58 = vrot.slane %v278_v51, %v3089_v53  ;;  %v291_v6 = vrot.slane %v278_v51, %v290_v5  ;;  %s1991_s23 = sshll.u32 %s2782_s22, 4  ;;  %s1992_s23 = int_to_ptr.vmem [resolvable:$true] %s1991_s23 }
  0xd4   :  { %v518_v19 = vunpack.c.0.s8 %v517_v18  ;;  %p2730_p12 = scmp.lt.s32.totalorder %s1992_s23, %s1992_s23 }
  0xd5   :  { %2276 = vmatpush3.bf16.msra.mxu1 %v2380_v44 }
  0xd6   :  { %438 = vmatpush1.bf16.msra.mxu0 %v2374_v36  ;;  %v241_v42 = vld [vmem:[#allocation2 + $0x8] sm:$0xff]  ;;  %2277 = vmatprep.subr.bf16.mxu1 %v2779_v1  ;;  %v521_v22 = vsub.s32 %v518_v19, %v3079_v49 }
  0xd7   :  { %v3063_v43 = vadd.f32 %v242_v37, %v241_v42  ;;  %2309 = vmatprep.subr.bf16.mxu0 %v2779_v1 }
  0xd8   :  { %v522_v23 = vrot.slane %v514_v21, %v521_v22 }
  0xd9   :  { %v245_v45 = vpack.c.bf16 %v3063_v43, %v3061_v41  ;;  %2278 = vmatpush3.bf16.msra.mxu1 %v2381_v46 }
  0xda   :  { %2279 = vmatprep.subr.bf16.mxu1 %v2779_v1  ;;  %v530_v24 = vrot.slane %v522_v23, %v521_v22  ;;  %v523_v26 = vcombine.high %v522_v23, %v522_v23 }
  0xdb   :  { %456 = vmatmul.mubr.bf16.vlgmr.msra.gmra.mrb[0].mxu0 %v245_v45 }
  0xdc   :  { %2325 = vmatprep.mubr.msk.bf16.mxu0 %vm2780_vm0, %v2779_v1  ;;  %v540_v25 = vmul.f32 -1e+09, %v530_v24  ;;  %v537_v28 = vrot.slane %v523_v26, %v521_v22  ;;  %v2061_v24 = vld [vmem:[%s3199_s7] ss:$0 sm:$0xff] }
  0xdd   :  { %2280 = vmatpush3.bf16.msra.mxu1 %v2382_v47 }
  0xde   :  { %2285 = vmatprep.subr.bf16.mxu1 %v2779_v1  ;;  %v629_v27 = vrot.slane %v540_v25, %v3089_v53  ;;  %v541_v35 = vmul.f32 -1e+09, %v537_v28 }
  0xe0   :  { %2282 = vmatmul.mubr.bf16.vlgmr.msra.gmra.mrb[0].mxu1 %v245_v45  ;;  %v633_v37 = vrot.slane %v541_v35, %v3089_v53  ;;  %v2394_v35 = vld [vmem:[#allocation13 + $0x10] ss:$8 sps:$4 sm:$0xff]  }
  0xe1   :  { %2287 = vmatprep.mubr.msk.bf16.mxu1 %vm2780_vm0, %v2779_v1 }
 0x1ae   :  { %v457_v54 = vpop.f32.mrb[0].mxu0 }
 0x1af   :  { %v459_v55 = vpop.f32.mrb[1].mxu0  ;;  %v458_v61 = vadd.f32 %v457_v54, %v283_v58 }
 0x1b0   :  { %v460_v56 = vadd.f32 %v459_v55, %v287_v52  ;;  %v461_v57 = vpop.f32.mrb[2].mxu0 }
 0x1b1   :  { %v463_v59 = vpop.f32.mrb[3].mxu0  ;;  %v507_v63 = vpack.c.bf16 %v458_v61, %v458_v61  ;;  %v462_v3 = vadd.f32 %v461_v57, %v283_v58  ;;  %v2384_v61 = vld [vmem:[#allocation11 + $0x8] sm:$0xff]  }
 0x1b2   :  { %v509_v60 = vpack.c.bf16 %v460_v56, %v460_v56  ;;  %v464_v62 = vadd.f32 %v463_v59, %v287_v52 }
 0x1b3   :  { %v508_v4 = vpack.c.bf16 %v462_v3, %v462_v3  ;;  %v500_v7 = vpop.f32.mrb[0].mxu1 }
 0x1b4   :  { %2286 = vmatpush3.bf16.xpose.msra.mxu1 %v509_v60  ;;  %v510_v2 = vpack.c.bf16 %v464_v62, %v464_v62  ;;  %v501_v8 = vadd.f32 %v500_v7, %v291_v6  ;;  %v2283_v9 = vpop.f32.mrb[1].mxu1  ;;  %v2383_v60 = vld [vmem:[#allocation11] sm:$0xff]   ;;  %v2385_v62 = vld [vmem:[#allocation11 + $0x10] sm:$0xff]  }
 0x1b5   :  { %2291 = vmatprep.subr.bf16.mxu1 %v2779_v1  ;;  %v503_v10 = vpop.f32.mrb[2].mxu1  ;;  %2310 = vmatpush3.bf16.msra.mxu0 %v2383_v60 }
 0x1b6   :  { %v511_v11 = vpack.c.bf16 %v501_v8, %v501_v8  ;;  %v504_v12 = vadd.f32 %v503_v10, %v291_v6  ;;  %v2284_v13 = vpop.f32.mrb[3].mxu1  ;;  %2311 = vmatprep.subr.bf16.mxu0 %v2779_v1 }
 0x1b7   :  { %v2389_v13 = vld [vmem:[#allocation11 + $0x30] sm:$0xff]  }
 0x1b8   :  { %v668_v14 = vsel %vm666_vm1, %v511_v11, 0  ;;  %v512_v15 = vpack.c.bf16 %v504_v12, %v504_v12  ;;  %v2388_v12 = vld [vmem:[#allocation11 + $0x28] sm:$0xff]  }
 0x1b9   :  { %2312 = vmatpush3.bf16.msra.mxu0 %v2384_v61 }
 0x1ba   :  { %v3101_v16 = vsel %vm666_vm1, %v512_v15, 0  ;;  %2313 = vmatprep.subr.bf16.mxu0 %v2779_v1 }
 0x1bb   :  { %2288 = vmatmul.mubr.bf16.vlgmr.msra.gmra.mrb[4].mxu1 %v507_v63  ;;  %v2386_v63 = vld [vmem:[#allocation11 + $0x18] sm:$0xff]  }
 0x1bc   :  { %2292 = vmatpush3.bf16.xpose.msra.mxu1 %v510_v2  ;;  %2293 = vmatprep.mubr.msk.bf16.mxu1 %vm2780_vm0, %v2779_v1  ;;  %v2387_v2 = vld [vmem:[#allocation11 + $0x20] sm:$0xff]  }
 0x1bd   :  { %2297 = vmatprep.subr.bf16.mxu1 %v2779_v1  ;;  %2314 = vmatpush3.bf16.msra.mxu0 %v2385_v62 }
 0x1be   :  { %2315 = vmatprep.subr.bf16.mxu0 %v2779_v1 }
 0x1c1   :  { %2316 = vmatpush3.bf16.msra.mxu0 %v2386_v63 }
 0x1c2   :  { %2317 = vmatprep.subr.bf16.mxu0 %v2779_v1 }
 0x1c3   :  { %2294 = vmatmul.mubr.bf16.vlgmr.msra.gmra.mrb[8].mxu1 %v508_v4 }
 0x1c4   :  { %2299 = vmatprep.mubr.msk.bf16.mxu1 %vm2780_vm0, %v2779_v1  ;;  %2298 = vmatpush3.bf16.msra.mxu1 %v668_v14  ;;  %v2390_v14 = vld [vmem:[#allocation11 + $0x38] sm:$0xff]  }
 0x1c5   :  { %2303 = vmatprep.subr.bf16.mxu1 %v2779_v1  ;;  %2318 = vmatpush3.bf16.msra.mxu0 %v2387_v2 }
 0x1c6   :  { %2319 = vmatprep.subr.bf16.mxu0 %v2779_v1 }
 0x1c9   :  { %2320 = vmatpush3.bf16.msra.mxu0 %v2388_v12 }
 0x1ca   :  { %2321 = vmatprep.subr.bf16.mxu0 %v2779_v1 }
 0x1cd   :  { %2322 = vmatpush3.bf16.msra.mxu0 %v2389_v13 }
 0x1ce   :  { %2323 = vmatprep.subr.bf16.mxu0 %v2779_v1 }
 0x1d1   :  { %2324 = vmatpush3.bf16.msra.mxu0 %v2390_v14 }
 0x28e   :  { %v576_v29 = vpop.f32.mrb[4].mxu1 }
 0x28f   :  { %v622_v30 = vmul.f32 0.088388346, %v576_v29  ;;  %v2289_v31 = vpop.f32.mrb[5].mxu1 }
 0x290   :  { %v579_v32 = vpop.f32.mrb[6].mxu1 }
 0x291   :  { %v2290_v33 = vpop.f32.mrb[7].mxu1  ;;  %v636_v34 = vadd.f32 %v629_v27, %v622_v30  ;;  %v2391_v32 = vld [vmem:[#allocation13] ss:$8 sps:$4 sm:$0xff]  }
 0x292   :  { %v2393_v33 = vld [vmem:[#allocation13 + $0x4] ss:$8 sps:$4 sm:$0xff]  }
 0x293   :  { %v639_v36 = vsel %vm638_vm2, %v636_v34, -inf }
 0x294   :  { %640 = vmax.xlane.f32.xlu0 %v639_v36 }
 0x296   :  { %v616_v38 = vpop.f32.mrb[8].mxu1 }
 0x297   :  { %v623_v39 = vmul.f32 0.088388346, %v616_v38  ;;  %v2295_v40 = vpop.f32.mrb[9].mxu1 }
 0x298   :  { %v619_v42 = vpop.f32.mrb[10].mxu1 }
 0x299   :  { %v2296_v44 = vpop.f32.mrb[11].mxu1  ;;  %v637_v45 = vadd.f32 %v633_v37, %v623_v39 }
 0x29b   :  { %v642_v46 = vsel %vm638_vm2, %v637_v45, -inf }
 0x29c   :  { %643 = vmax.xlane.f32.xlu0 %v642_v46  ;;  %v2402_v46 = vld [vmem:[#allocation13 + $0x34] ss:$8 sps:$4 sm:$0xff]  }
 0x321   :  { %v641_v47 = vpop.xlane.xlu0 %640 }
 0x322   :  { %v645_v48 = vsub.f32 %v636_v34, %v641_v47  ;;  %v2396_v34 = vld [vmem:[#allocation13 + $0x14] ss:$8 sps:$4 sm:$0xff]   ;;  %v2400_v47 = vld [vmem:[#allocation13 + $0x30] ss:$8 sps:$4 sm:$0xff]  }
 0x324   :  { %v647_v51 = vmul.f32 1.442695, %v645_v48  ;;  %v2405_v48 = vld [vmem:[#allocation13 + $0x44] ss:$8 sps:$4 sm:$0xff]  }
 0x326   :  { %2511 = vpow2.f32 %v647_v51  ;;  %v2403_v51 = vld [vmem:[#allocation13 + $0x40] ss:$8 sps:$4 sm:$0xff]  }
 0x329   :  { %v644_v52 = vpop.xlane.xlu0 %643 }
 0x32a   :  { %v646_v54 = vsub.f32 %v637_v45, %v644_v52  ;;  %v2397_v45 = vld [vmem:[#allocation13 + $0x20] ss:$8 sps:$4 sm:$0xff]   ;;  %v2408_v52 = vld [vmem:[#allocation13 + $0x54] ss:$8 sps:$4 sm:$0xff]  }
 0x32c   :  { %v649_v55 = vmul.f32 1.442695, %v646_v54  ;;  %v2406_v54 = vld [vmem:[#allocation13 + $0x50] ss:$8 sps:$4 sm:$0xff]  }
 0x32e   :  { %2513 = vpow2.f32 %v649_v55  ;;  %v2411_v55 = vld [vmem:[#allocation13 + $0x64] ss:$8 sps:$4 sm:$0xff]  }
 0x330   :  { %v2512_v56 = vpop.eup %2511 }
 0x331   :  { %v651_v57 = vsel %vm638_vm2, %v2512_v56, 0.0 }
 0x332   :  { %652 = vadd.xlane.f32.xlu1 %v651_v57  ;;  %v2414_v57 = vld [vmem:[#allocation13 + $0x74] ss:$8 sps:$4 sm:$0xff]  }
 0x338   :  { %v2514_v58 = vpop.eup %2513 }
 0x339   :  { %v654_v59 = vsel %vm638_vm2, %v2514_v58, 0.0 }
 0x33a   :  { %655 = vadd.xlane.f32.xlu1 %v654_v59 }
 0x3bf   :  { %v653_v3 = vpop.xlane.xlu1 %652 }
 0x3c0   :  { %2515 = vrcp.f32 %v653_v3 }
 0x3c7   :  { %v656_v4 = vpop.xlane.xlu1 %655 }
 0x3c8   :  { %2517 = vrcp.f32 %v656_v4  ;;  %v2070_v4 = vld [vmem:[%s3200_s8] ss:$0 sm:$0xff] }
 0x3ca   :  { %v2516_v6 = vpop.eup %2515 }
 0x3cb   :  { %v659_v7 = vmul.f32 %v2516_v6, %v2512_v56  ;;  %v2409_v56 = vld [vmem:[#allocation13 + $0x60] ss:$8 sps:$4 sm:$0xff]  }
 0x3cd   :  { %v661_v8 = vpack.c.bf16 %v659_v7, %v659_v7 }
 0x3cf   :  { %2300 = vmatmul.mubr.msk.bf16.vlgmr.msra.gmra.mrb[12].mxu1 %vm638_vm2, %v661_v8 }
 0x3d0   :  { %2304 = vmatpush3.bf16.msra.mxu1 %v3101_v16  ;;  %2305 = vmatprep.mubr.msk.bf16.mxu1 %vm2780_vm0, %v2779_v1 }
 0x3d1   :  { %1021 = vmatprep.subr.bf16.mxu1 %v2393_v33 }
 0x3d2   :  { %v2518_v9 = vpop.eup %2517 }
 0x3d3   :  { %v660_v10 = vmul.f32 %v2518_v9, %v2514_v58  ;;  %v2412_v58 = vld [vmem:[#allocation13 + $0x70] ss:$8 sps:$4 sm:$0xff]  }
 0x3d5   :  { %v662_v11 = vpack.c.bf16 %v660_v10, %v660_v10  ;;  %v2071_v10 = vld [vmem:[%s3201_s9] ss:$0 sm:$0xff] }
 0x3d7   :  { %2306 = vmatmul.mubr.msk.bf16.vlgmr.msra.gmra.mrb[16].mxu1 %vm638_vm2, %v662_v11 }
 0x3d8   :  { %1053 = vmatprep.mubr.bf16.mxu1 %v2778_v0  ;;  %1022 = vmatpush1.bf16.msra.mxu1 %v2391_v32 }
 0x3d9   :  { %1023 = vmatprep.subr.bf16.mxu1 %v2396_v34 }
 0x3dc   :  { %1024 = vmatpush1.bf16.msra.mxu1 %v2394_v35 }
 0x4a2   :  { %v704_v15 = vpop.f32.mrb[12].mxu1 }
 0x4a3   :  { %v2301_v16 = vpop.f32.mrb[13].mxu1 }
 0x4a4   :  { %v707_v17 = vpop.f32.mrb[14].mxu1  ;;  %v2416_v16 = vld [vmem:[#allocation14] sm:$0xff]  }
 0x4a5   :  { %v2302_v18 = vpop.f32.mrb[15].mxu1  ;;  %v2417_v17 = vld [vmem:[#allocation14 + $0x48] sm:$0xff]  }
 0x4a6   :  { %v2418_v18 = vld [vmem:[#allocation14 + $0x8] sm:$0xff]  }
 0x4aa   :  { %v750_v19 = vpop.f32.mrb[16].mxu1 }
 0x4ab   :  { %v756_v20 = vpack.c.bf16 %v750_v19, %v704_v15  ;;  %v2307_v21 = vpop.f32.mrb[17].mxu1  ;;  %v2415_v15 = vld [vmem:[#allocation14 + $0x40] sm:$0xff]   ;;  %v2419_v19 = vld [vmem:[#allocation14 + $0x50] sm:$0xff]  }
 0x4ac   :  { %v753_v22 = vpop.f32.mrb[18].mxu1  ;;  %2199 = vmatprep.subr.bf16.mxu0 %v2415_v15  ;;  %v2421_v21 = vld [vmem:[#allocation14 + $0x58] sm:$0xff]  }
 0x4ad   :  { %v2308_v23 = vpop.f32.mrb[19].mxu1  ;;  %2326 = vmatmul.mubr.bf16.vlgmr.msra.gmra.mrb[4].mxu0 %v756_v20  ;;  %v2420_v20 = vld [vmem:[#allocation14 + $0x10] sm:$0xff]   ;;  %v2422_v22 = vld [vmem:[#allocation14 + $0x18] sm:$0xff]  }
 0x4ae   :  { %2200 = vmatpush3.bf16.msra.mxu0 %v2416_v16  ;;  %v2423_v23 = vld [vmem:[#allocation14 + $0x60] sm:$0xff]  }
 0x4af   :  { %2201 = vmatprep.subr.bf16.mxu0 %v2417_v17 }
 0x4b2   :  { %2202 = vmatpush3.bf16.msra.mxu0 %v2418_v18 }
 0x4b3   :  { %2203 = vmatprep.subr.bf16.mxu0 %v2419_v19 }
 0x4b6   :  { %2204 = vmatpush3.bf16.msra.mxu0 %v2420_v20 }
 0x4b7   :  { %2205 = vmatprep.subr.bf16.mxu0 %v2421_v21 }
 0x4ba   :  { %2206 = vmatpush3.bf16.msra.mxu0 %v2422_v22 }
 0x4bb   :  { %2207 = vmatprep.subr.bf16.mxu0 %v2423_v23 }
 0x580   :  { %v862_v25 = vpop.f32.mrb[4].mxu0 }
 0x581   :  { %v863_v26 = vadd.f32 %v2061_v24, %v862_v25  ;;  %v2327_v27 = vpop.f32.mrb[5].mxu0  ;;  %v2425_v25 = vld [vmem:[#allocation14 + $0x68] sm:$0xff]  }
 0x582   :  { %v865_v1 = vpop.f32.mrb[6].mxu0  ;;  %v2427_v27 = vld [vmem:[#allocation14 + $0x70] sm:$0xff]  }
 0x583   :  { %v866_v28 = vadd.f32 %v2061_v24, %v865_v1  ;;  %v2328_v29 = vpop.f32.mrb[7].mxu0  ;;  %v869_v30 = vadd.f32 %v863_v26, %v3061_v41  ;;  %v2424_v24 = vld [vmem:[#allocation14 + $0x20] sm:$0xff]   ;;  %v2426_v26 = vld [vmem:[#allocation14 + $0x28] sm:$0xff]   ;;  %v2428_v1 = vld [vmem:[#allocation14 + $0x30] sm:$0xff]  }
 0x584   :  { %2208 = vmatpush3.bf16.msra.mxu0 %v2424_v24  ;;  %v2430_v29 = vld [vmem:[#allocation14 + $0x38] sm:$0xff]   ;;  %v2088_v24 = vld [vmem:[%s3205_s13] ss:$0 sm:$0xff] }
 0x585   :  { %871 = vadd.xlane.f32.xlu0 %v869_v30  ;;  %v870_v31 = vadd.f32 %v866_v28, %v3063_v43  ;;  %v2399_v43 = vld [vmem:[#allocation13 + $0x24] ss:$8 sps:$4 sm:$0xff]   ;;  %2209 = vmatprep.subr.bf16.mxu0 %v2425_v25  ;;  %v2429_v28 = vld [vmem:[#allocation14 + $0x78] sm:$0xff]  }
 0x586   :  { %1025 = vmatprep.subr.bf16.mxu1 %v2399_v43 }
 0x587   :  { %873 = vadd.xlane.f32.xlu1 %v870_v31  ;;  %1026 = vmatpush1.bf16.msra.mxu1 %v2397_v45 }
 0x588   :  { %1027 = vmatprep.subr.bf16.mxu1 %v2402_v46  ;;  %2210 = vmatpush3.bf16.msra.mxu0 %v2426_v26 }
 0x589   :  { %2211 = vmatprep.subr.bf16.mxu0 %v2427_v27 }
 0x58b   :  { %1028 = vmatpush1.bf16.msra.mxu1 %v2400_v47 }
 0x58c   :  { %1029 = vmatprep.subr.bf16.mxu1 %v2405_v48  ;;  %2212 = vmatpush3.bf16.msra.mxu0 %v2428_v1 }
 0x58d   :  { %2213 = vmatprep.subr.bf16.mxu0 %v2429_v28 }
 0x58f   :  { %1030 = vmatpush1.bf16.msra.mxu1 %v2403_v51 }
 0x590   :  { %1031 = vmatprep.subr.bf16.mxu1 %v2408_v52  ;;  %2214 = vmatpush3.bf16.msra.mxu0 %v2430_v29 }
 0x593   :  { %1032 = vmatpush1.bf16.msra.mxu1 %v2406_v54 }
 0x594   :  { %1033 = vmatprep.subr.bf16.mxu1 %v2411_v55 }
 0x597   :  { %1034 = vmatpush1.bf16.msra.mxu1 %v2409_v56 }
 0x598   :  { %1035 = vmatprep.subr.bf16.mxu1 %v2414_v57 }
 0x59b   :  { %1036 = vmatpush1.bf16.msra.mxu1 %v2412_v58 }
 0x612   :  { %v872_v36 = vpop.xlane.xlu0 %871 }
 0x613   :  { %v876_v37 = vmul.f32 0.0078125, %v872_v36 }
 0x614   :  { %v874_v38 = vpop.xlane.xlu1 %873 }
 0x615   :  { %v878_v39 = vsub.f32 %v869_v30, %v876_v37  ;;  %v877_v40 = vmul.f32 0.0078125, %v874_v38  ;;  %v929_v30 = vld [vmem:[%s3203_s11] sm:$0x3] }
 0x616   :  { %v938_v32 = vrot.slane %v929_v30, %v3082_v50 }
 0x617   :  { %v879_v42 = vsub.f32 %v870_v31, %v877_v40  ;;  %v880_v44 = vmul.f32 %v878_v39, %v878_v39  ;;  %v934_v31 = vrot.slane %v929_v30, %v3089_v53 }
 0x619   :  { %882 = vadd.xlane.f32.xlu0 %v880_v44  ;;  %v881_v41 = vmul.f32 %v879_v42, %v879_v42 }
 0x61b   :  { %884 = vadd.xlane.f32.xlu1 %v881_v41 }
 0x6a6   :  { %v883_v59 = vpop.xlane.xlu0 %882 }
 0x6a7   :  { %v886_v60 = vmul.f32 0.0078125, %v883_v59 }
 0x6a8   :  { %v885_v61 = vpop.xlane.xlu1 %884 }
 0x6a9   :  { %v888_v62 = vadd.f32 1e-05, %v886_v60  ;;  %v887_v63 = vmul.f32 0.0078125, %v885_v61 }
 0x6ab   :  { %2519 = vrsqrt.f32 %v888_v62  ;;  %v889_v2 = vadd.f32 1e-05, %v887_v63 }
 0x6ad   :  { %2521 = vrsqrt.f32 %v889_v2 }
 0x6b5   :  { %v2520_v3 = vpop.eup %2519 }
 0x6b6   :  { %v892_v6 = vmul.f32 %v2520_v3, %v878_v39 }
 0x6b7   :  { %v2522_v7 = vpop.eup %2521 }
 0x6b8   :  { %v893_v8 = vmul.f32 %v2522_v7, %v879_v42  ;;  %v901_v9 = vmul.f32 %v2070_v4, %v892_v6 }
 0x6ba   :  { %v902_v11 = vmul.f32 %v2070_v4, %v893_v8  ;;  %v3135_v12 = vadd.f32 %v2071_v10, %v901_v9 }
 0x6bc   :  { %v3137_v13 = vadd.f32 %v2071_v10, %v902_v11 }
 0x6be   :  { %v912_v14 = vpack.c.bf16 %v3137_v13, %v3135_v12 }
 0x6c0   :  { %1054 = vmatmul.mubr.bf16.vlgmr.msra.gmra.mrb[20].mxu1 %v912_v14 }
 0x6c1   :  { %1577 = vmatprep.mubr.bf16.mxu1 %v2778_v0 }
 0x793   :  { %v1055_v33 = vpop.f32.mrb[20].mxu1 }
 0x794   :  { %v1056_v34 = vadd.f32 %v1055_v33, %v934_v31  ;;  %v1057_v35 = vpop.f32.mrb[21].mxu1 }
 0x795   :  { %v1058_v36 = vadd.f32 %v1057_v35, %v938_v32  ;;  %v1059_v37 = vpop.f32.mrb[22].mxu1 }
 0x796   :  { %v1064_v38 = vmul.f32 %v1056_v34, %v1056_v34  ;;  %v1060_v39 = vadd.f32 %v1059_v37, %v934_v31  ;;  %v1061_v40 = vpop.f32.mrb[23].mxu1 }
 0x797   :  { %v1065_v42 = vmul.f32 %v1058_v36, %v1058_v36  ;;  %v1062_v44 = vadd.f32 %v1061_v40, %v938_v32  ;;  %v2436_v40 = vld [vmem:[#allocation16 + $0xc] ss:$16 sps:$4 sm:$0xff]  }
 0x798   :  { %v1068_v41 = vmul.f32 %v1064_v38, %v1056_v34  ;;  %v1066_v43 = vmul.f32 %v1060_v39, %v1060_v39  ;;  %1586 = vmatprep.subr.bf16.mxu0 %v2436_v40  ;;  %v2484_v40 = vld [vmem:[#allocation17 + $0xc8] sm:$0xff]  }
 0x799   :  { %v1069_v45 = vmul.f32 %v1065_v42, %v1058_v36  ;;  %v1067_v46 = vmul.f32 %v1062_v44, %v1062_v44  ;;  %v2434_v42 = vld [vmem:[#allocation16 + $0x8] ss:$16 sps:$4 sm:$0xff]  }
 0x79a   :  { %v1072_v47 = vmul.f32 0.044715, %v1068_v41  ;;  %v1070_v48 = vmul.f32 %v1066_v43, %v1060_v39  ;;  %v2442_v41 = vld [vmem:[#allocation16 + $0x2c] ss:$16 sps:$4 sm:$0xff]   ;;  %v2437_v43 = vld [vmem:[#allocation16 + $0x20] ss:$16 sps:$4 sm:$0xff]  }
 0x79b   :  { %v1073_v51 = vmul.f32 0.044715, %v1069_v45  ;;  %v1071_v52 = vmul.f32 %v1067_v46, %v1062_v44  ;;  %v2440_v45 = vld [vmem:[#allocation16 + $0x28] ss:$16 sps:$4 sm:$0xff]   ;;  %v2445_v46 = vld [vmem:[#allocation16 + $0x44] ss:$16 sps:$4 sm:$0xff]  }
 0x79c   :  { %v1076_v54 = vadd.f32 %v1072_v47, %v1056_v34  ;;  %v1074_v55 = vmul.f32 0.044715, %v1070_v48  ;;  %v2448_v47 = vld [vmem:[#allocation16 + $0x4c] ss:$16 sps:$4 sm:$0xff]   ;;  %v2443_v48 = vld [vmem:[#allocation16 + $0x40] ss:$16 sps:$4 sm:$0xff]  }
 0x79d   :  { %v1077_v56 = vadd.f32 %v1073_v51, %v1058_v36  ;;  %v1075_v57 = vmul.f32 0.044715, %v1071_v52  ;;  %v2446_v51 = vld [vmem:[#allocation16 + $0x48] ss:$16 sps:$4 sm:$0xff]   ;;  %v2451_v52 = vld [vmem:[#allocation16 + $0x64] ss:$16 sps:$4 sm:$0xff]  }
 0x79e   :  { %v1080_v58 = vmul.f32 0.7978846, %v1076_v54  ;;  %v1078_v59 = vadd.f32 %v1074_v55, %v1060_v39  ;;  %v2454_v54 = vld [vmem:[#allocation16 + $0x6c] ss:$16 sps:$4 sm:$0xff]   ;;  %v2449_v55 = vld [vmem:[#allocation16 + $0x60] ss:$16 sps:$4 sm:$0xff]  }
 0x79f   :  { %v1081_v60 = vmul.f32 0.7978846, %v1077_v56  ;;  %v1079_v61 = vadd.f32 %v1075_v57, %v1062_v44  ;;  %v2452_v56 = vld [vmem:[#allocation16 + $0x68] ss:$16 sps:$4 sm:$0xff]   ;;  %v2457_v57 = vld [vmem:[#allocation16 + $0x84] ss:$16 sps:$4 sm:$0xff]  }
 0x7a0   :  { %2523 = vtanh.f32 %v1080_v58  ;;  %v1082_v62 = vmul.f32 0.7978846, %v1078_v59  ;;  %v2460_v58 = vld [vmem:[#allocation16 + $0x8c] ss:$16 sps:$4 sm:$0xff]   ;;  %v2455_v59 = vld [vmem:[#allocation16 + $0x80] ss:$16 sps:$4 sm:$0xff]  }
 0x7a1   :  { %2525 = vtanh.f32 %v1081_v60  ;;  %v1083_v63 = vmul.f32 0.7978846, %v1079_v61  ;;  %v2458_v60 = vld [vmem:[#allocation16 + $0x88] ss:$16 sps:$4 sm:$0xff]   ;;  %v2461_v61 = vld [vmem:[#allocation16 + $0xa0] ss:$16 sps:$4 sm:$0xff]  }
 0x7a2   :  { %2527 = vtanh.f32 %v1082_v62  ;;  %v2463_v62 = vld [vmem:[#allocation16 + $0xa4] ss:$16 sps:$4 sm:$0xff]  }
 0x7a3   :  { %2529 = vtanh.f32 %v1083_v63  ;;  %v2464_v63 = vld [vmem:[#allocation16 + $0xa8] ss:$16 sps:$4 sm:$0xff]  }
 0x7aa   :  { %v2524_v2 = vpop.eup %2523 }
 0x7ab   :  { %v2526_v3 = vpop.eup %2525  ;;  %v1088_v4 = vadd.f32 1.0, %v2524_v2  ;;  %v2466_v2 = vld [vmem:[#allocation16 + $0xac] ss:$16 sps:$4 sm:$0xff]  }
 0x7ac   :  { %v2528_v6 = vpop.eup %2527  ;;  %v1089_v7 = vadd.f32 1.0, %v2526_v3  ;;  %v2469_v3 = vld [vmem:[#allocation16 + $0xc4] ss:$16 sps:$4 sm:$0xff]  }
 0x7ad   :  { %v2530_v8 = vpop.eup %2529  ;;  %v1092_v9 = vmul.f32 0.5, %v1088_v4  ;;  %v1090_v10 = vadd.f32 1.0, %v2528_v6  ;;  %v2472_v4 = vld [vmem:[#allocation16 + $0xcc] ss:$16 sps:$4 sm:$0xff]   ;;  %v2467_v6 = vld [vmem:[#allocation16 + $0xc0] ss:$16 sps:$4 sm:$0xff]  }
 0x7ae   :  { %v1091_v11 = vadd.f32 1.0, %v2530_v8  ;;  %v1093_v14 = vmul.f32 0.5, %v1089_v7  ;;  %v2470_v7 = vld [vmem:[#allocation16 + $0xc8] ss:$16 sps:$4 sm:$0xff]   ;;  %v2475_v8 = vld [vmem:[#allocation16 + $0xe4] ss:$16 sps:$4 sm:$0xff]  }
 0x7af   :  { %v1094_v15 = vmul.f32 0.5, %v1090_v10  ;;  %v1096_v17 = vmul.f32 %v1092_v9, %v1056_v34  ;;  %v2478_v9 = vld [vmem:[#allocation16 + $0xec] ss:$16 sps:$4 sm:$0xff]   ;;  %v2473_v10 = vld [vmem:[#allocation16 + $0xe0] ss:$16 sps:$4 sm:$0xff]  }
 0x7b0   :  { %v1095_v16 = vmul.f32 0.5, %v1091_v11  ;;  %v1097_v19 = vmul.f32 %v1093_v14, %v1058_v36  ;;  %v2476_v11 = vld [vmem:[#allocation16 + $0xe8] ss:$16 sps:$4 sm:$0xff]   ;;  %v2479_v14 = vld [vmem:[#allocation17 + $0x40] sm:$0xff]  }
 0x7b1   :  { %v1098_v18 = vmul.f32 %v1094_v15, %v1060_v39  ;;  %v2480_v15 = vld [vmem:[#allocation17 + $0xc0] sm:$0xff]  }
 0x7b2   :  { %v1099_v20 = vmul.f32 %v1095_v16, %v1062_v44  ;;  %v2439_v44 = vld [vmem:[#allocation16 + $0x24] ss:$16 sps:$4 sm:$0xff]  }
 0x7b3   :  { %v1100_v21 = vpack.c.bf16 %v1098_v18, %v1096_v17 }
 0x7b4   :  { %v1101_v22 = vpack.c.bf16 %v1099_v20, %v1097_v19 }
 0x7b6   :  { %1269 = vmatprep.mubr.bf16.mxu0 %v1101_v22 }
 0x7b7   :  { %1270 = vmatmul.mubr.bf16.vlgmr.msra.gmra.mrb[8].mxu0 %v1100_v21 }
 0x7b8   :  { %1618 = vmatprep.mubr.bf16.mxu0 %v2778_v0  ;;  %1587 = vmatpush1.bf16.msra.mxu0 %v2434_v42  ;;  %v2487_v42 = vld [vmem:[#allocation17 + $0x50] sm:$0xff]  }
 0x7b9   :  { %1588 = vmatprep.subr.bf16.mxu0 %v2442_v41  ;;  %v2489_v41 = vld [vmem:[#allocation17 + $0x10] sm:$0xff]  }
 0x7bc   :  { %1589 = vmatpush1.bf16.msra.mxu0 %v2440_v45  ;;  %v2491_v45 = vld [vmem:[#allocation17 + $0x58] sm:$0xff]  }
 0x7bd   :  { %1590 = vmatprep.subr.bf16.mxu0 %v2448_v47  ;;  %v2493_v47 = vld [vmem:[#allocation17 + $0x18] sm:$0xff]  }
 0x7c0   :  { %1591 = vmatpush1.bf16.msra.mxu0 %v2446_v51  ;;  %v2495_v51 = vld [vmem:[#allocation17 + $0x60] sm:$0xff]  }
 0x7c1   :  { %1592 = vmatprep.subr.bf16.mxu0 %v2454_v54  ;;  %v2497_v54 = vld [vmem:[#allocation17 + $0x20] sm:$0xff]  }
 0x7c4   :  { %1593 = vmatpush1.bf16.msra.mxu0 %v2452_v56  ;;  %v2499_v56 = vld [vmem:[#allocation17 + $0x68] sm:$0xff]  }
 0x7c5   :  { %1594 = vmatprep.subr.bf16.mxu0 %v2460_v58  ;;  %v2501_v58 = vld [vmem:[#allocation17 + $0x28] sm:$0xff]  }
 0x7c8   :  { %1595 = vmatpush1.bf16.msra.mxu0 %v2458_v60  ;;  %v2503_v60 = vld [vmem:[#allocation17 + $0x70] sm:$0xff]  }
 0x7c9   :  { %1596 = vmatprep.subr.bf16.mxu0 %v2466_v2  ;;  %v2507_v2 = vld [vmem:[#allocation17 + $0x78] sm:$0xff]  }
 0x7cc   :  { %1597 = vmatpush1.bf16.msra.mxu0 %v2464_v63  ;;  %v2506_v63 = vld [vmem:[#allocation17 + $0xb0] sm:$0xff]  }
 0x7cd   :  { %1598 = vmatprep.subr.bf16.mxu0 %v2472_v4  ;;  %v2509_v4 = vld [vmem:[#allocation17 + $0x38] sm:$0xff]  }
 0x7d0   :  { %1599 = vmatpush1.bf16.msra.mxu0 %v2470_v7  ;;  %v1354_v7 = vld [vmem:[%s3209_s17] sm:$0xf] }
 0x7d1   :  { %1600 = vmatprep.subr.bf16.mxu0 %v2478_v9  ;;  %v1359_v9 = vrot.slane %v1354_v7, %v3089_v53 }
 0x7d4   :  { %1601 = vmatpush1.bf16.msra.mxu0 %v2476_v11  ;;  %v1363_v11 = vrot.slane %v1354_v7, %v3082_v50 }
 0x7d5   :  { %2243 = vmatprep.subr.bf16.mxu0 %v2480_v15 }
 0x88a   :  { %v2215_v23 = vpop.f32.mrb[8].mxu0 }
 0x88b   :  { %v2216_v25 = vpop.f32.mrb[9].mxu0 }
 0x88c   :  { %v2217_v26 = vadd.f32 %v2216_v25, %v2215_v23  ;;  %v2218_v27 = vpop.f32.mrb[10].mxu0  ;;  %v2105_v23 = vld [vmem:[%s3234_s1] ss:$0 sm:$0xff] }
 0x88d   :  { %v2219_v1 = vpop.f32.mrb[11].mxu0 }
 0x88e   :  { %v1272_v28 = vadd.f32 %v2217_v26, %v2088_v24  ;;  %v2220_v29 = vadd.f32 %v2219_v1, %v2218_v27  ;;  %v2106_v26 = vld [vmem:[%s3207_s15] ss:$0 sm:$0xff] }
 0x890   :  { %v1275_v30 = vadd.f32 %v2220_v29, %v2088_v24  ;;  %v1278_v31 = vadd.f32 %v1272_v28, %v3135_v12  ;;  %v2433_v12 = vld [vmem:[#allocation16 + $0x4] ss:$16 sps:$4 sm:$0xff]  }
 0x891   :  { %1545 = vmatprep.subr.bf16.mxu1 %v2433_v12  ;;  %v2483_v12 = vld [vmem:[#allocation17 + $0x48] sm:$0xff]  }
 0x892   :  { %1280 = vadd.xlane.f32.xlu1 %v1278_v31  ;;  %v1279_v32 = vadd.f32 %v1275_v30, %v3137_v13  ;;  %v2431_v13 = vld [vmem:[#allocation16] ss:$16 sps:$4 sm:$0xff]  }
 0x893   :  { %1546 = vmatpush1.bf16.msra.mxu1 %v2431_v13  ;;  %v2486_v13 = vld [vmem:[#allocation17 + $0x88] sm:$0xff]  }
 0x894   :  { %1282 = vadd.xlane.f32.xlu0 %v1279_v32  ;;  %1547 = vmatprep.subr.bf16.mxu1 %v2439_v44  ;;  %v2488_v44 = vld [vmem:[#allocation17 + $0xd0] sm:$0xff]  }
 0x897   :  { %1548 = vmatpush1.bf16.msra.mxu1 %v2437_v43  ;;  %v2490_v43 = vld [vmem:[#allocation17 + $0x90] sm:$0xff]  }
 0x898   :  { %1549 = vmatprep.subr.bf16.mxu1 %v2445_v46  ;;  %v2492_v46 = vld [vmem:[#allocation17 + $0xd8] sm:$0xff]  }
 0x89b   :  { %1550 = vmatpush1.bf16.msra.mxu1 %v2443_v48  ;;  %v2494_v48 = vld [vmem:[#allocation17 + $0x98] sm:$0xff]  }
 0x89c   :  { %1551 = vmatprep.subr.bf16.mxu1 %v2451_v52  ;;  %v2496_v52 = vld [vmem:[#allocation17 + $0xe0] sm:$0xff]  }
 0x89f   :  { %1552 = vmatpush1.bf16.msra.mxu1 %v2449_v55  ;;  %v2498_v55 = vld [vmem:[#allocation17 + $0xa0] sm:$0xff]  }
 0x8a0   :  { %1553 = vmatprep.subr.bf16.mxu1 %v2457_v57  ;;  %v2500_v57 = vld [vmem:[#allocation17 + $0xe8] sm:$0xff]  }
 0x8a3   :  { %1554 = vmatpush1.bf16.msra.mxu1 %v2455_v59  ;;  %v2502_v59 = vld [vmem:[#allocation17 + $0xa8] sm:$0xff]  }
 0x8a4   :  { %1555 = vmatprep.subr.bf16.mxu1 %v2463_v62  ;;  %v2505_v62 = vld [vmem:[#allocation17 + $0x30] sm:$0xff]  }
 0x8a7   :  { %1556 = vmatpush1.bf16.msra.mxu1 %v2461_v61  ;;  %v2504_v61 = vld [vmem:[#allocation17 + $0xf0] sm:$0xff]  }
 0x8a8   :  { %1557 = vmatprep.subr.bf16.mxu1 %v2469_v3  ;;  %v2508_v3 = vld [vmem:[#allocation17 + $0xf8] sm:$0xff]  }
 0x8ab   :  { %1558 = vmatpush1.bf16.msra.mxu1 %v2467_v6  ;;  %v2510_v6 = vld [vmem:[#allocation17 + $0xb8] sm:$0xff]  }
 0x8ac   :  { %1559 = vmatprep.subr.bf16.mxu1 %v2475_v8  ;;  %v1370_v8 = vsub.s32 3, %v3079_v49 }
 0x8af   :  { %1560 = vmatpush1.bf16.msra.mxu1 %v2473_v10  ;;  %v1367_v10 = vrot.slane %v1354_v7, %v290_v5 }
 0x8b0   :  { %2221 = vmatprep.subr.bf16.mxu1 %v2479_v14  ;;  %v1371_v14 = vrot.slane %v1354_v7, %v1370_v8 }
 0x91f   :  { %v1281_v33 = vpop.xlane.xlu1 %1280 }
 0x920   :  { %v1284_v0 = vmul.f32 0.0078125, %v1281_v33 }
 0x921   :  { %v1283_v34 = vpop.xlane.xlu0 %1282 }
 0x922   :  { %v3153_v35 = vsub.f32 %v1278_v31, %v1284_v0  ;;  %v1285_v36 = vmul.f32 0.0078125, %v1283_v34 }
 0x924   :  { %v3155_v37 = vsub.f32 %v1279_v32, %v1285_v36  ;;  %v1288_v38 = vmul.f32 %v3153_v35, %v3153_v35 }
 0x926   :  { %1290 = vadd.xlane.f32.xlu1 %v1288_v38  ;;  %v1289_v39 = vmul.f32 %v3155_v37, %v3155_v37  ;;  %v2481_v38 = vld [vmem:[#allocation17] sm:$0xff]  }
 0x928   :  { %1292 = vadd.xlane.f32.xlu0 %v1289_v39 }
 0x9b3   :  { %v1291_v16 = vpop.xlane.xlu1 %1290 }
 0x9b4   :  { %v1294_v17 = vmul.f32 0.0078125, %v1291_v16 }
 0x9b5   :  { %v1293_v18 = vpop.xlane.xlu0 %1292 }
 0x9b6   :  { %v1296_v19 = vadd.f32 1e-05, %v1294_v17  ;;  %v1295_v20 = vmul.f32 0.0078125, %v1293_v18 }
 0x9b8   :  { %2531 = vrsqrt.f32 %v1296_v19  ;;  %v1297_v21 = vadd.f32 1e-05, %v1295_v20 }
 0x9ba   :  { %2533 = vrsqrt.f32 %v1297_v21 }
 0x9c2   :  { %v2532_v22 = vpop.eup %2531 }
 0x9c3   :  { %v1300_v24 = vmul.f32 %v2532_v22, %v3153_v35  ;;  %v2482_v35 = vld [vmem:[#allocation17 + $0x80] sm:$0xff]  }
 0x9c4   :  { %v2534_v25 = vpop.eup %2533 }
 0x9c5   :  { %v1309_v27 = vmul.f32 %v2105_v23, %v1300_v24  ;;  %v1301_v1 = vmul.f32 %v2534_v25, %v3155_v37  ;;  %v2485_v37 = vld [vmem:[#allocation17 + $0x8] sm:$0xff]  }
 0x9c7   :  { %v1310_v28 = vmul.f32 %v2105_v23, %v1301_v1  ;;  %v1318_v29 = vadd.f32 %v2106_v26, %v1309_v27 }
 0x9c9   :  { %v1319_v30 = vadd.f32 %v2106_v26, %v1310_v28  ;;  %v1320_v31 = vpack.c.bf16 %v1318_v29, %v1318_v29 }
 0x9cb   :  { %v1321_v32 = vpack.c.bf16 %v1319_v30, %v1319_v30  ;;  %v1378_v0 = vunpack.c.l.b16 %v1320_v31 }
 0x9cd   :  { %v1379_v33 = vunpack.c.l.b16 %v1321_v32  ;;  %v2139_v32 = vld [vmem:[%s3211_s19] ss:$0 sm:$0xff]  ;;  %s2725_s19 = scalar_lea.vmem %s1992_s23, 32 }
 0x9ce   :  { %p2726_p11 = scmp.ne.s32.totalorder %s1992_s23, %s2725_s19  ;;  %p2731_p13 = scmp.lt.s32.totalorder %s2725_s19, %s2725_s19 }
 0x9cf   :  { %v1380_v34 = vrot.slane %v1379_v33, 7 }
 0x9d0   :  { %p2732_p0 = por %p2731_p13, %p2730_p12 }
 0x9d1   :  { %v1382_v36 = vsel %vm1381_vm3, %v1380_v34, %v1378_v0 }
 0x9d2   :  { %v1383_v39 = vpack.c.b16 %v1382_v36, %v1382_v36  ;;  %p2733_p1 = pnand %p2732_p0, %p2726_p11 }
 0x9d4   :  { %1578 = vmatmul.mubr.bf16.vlgmr.msra.gmra.mrb[24].mxu1 %v1383_v39  ;;  %1619 = vmatmul.mubr.bf16.vlgmr.msra.gmra.mrb[12].mxu0 %v1383_v39 }
 0x9d5   :  { %2222 = vmatpush3.bf16.msra.mxu1 %v2481_v38  ;;  %2244 = vmatpush3.bf16.msra.mxu0 %v2482_v35 }
 0x9d6   :  { %2223 = vmatprep.subr.bf16.mxu1 %v2483_v12  ;;  %2245 = vmatprep.subr.bf16.mxu0 %v2484_v40 }
 0x9d9   :  { %2224 = vmatpush3.bf16.msra.mxu1 %v2485_v37  ;;  %2246 = vmatpush3.bf16.msra.mxu0 %v2486_v13 }
 0x9da   :  { %2225 = vmatprep.subr.bf16.mxu1 %v2487_v42  ;;  %2247 = vmatprep.subr.bf16.mxu0 %v2488_v44 }
 0x9dd   :  { %2226 = vmatpush3.bf16.msra.mxu1 %v2489_v41  ;;  %2248 = vmatpush3.bf16.msra.mxu0 %v2490_v43 }
 0x9de   :  { %2227 = vmatprep.subr.bf16.mxu1 %v2491_v45  ;;  %2249 = vmatprep.subr.bf16.mxu0 %v2492_v46 }
 0x9e1   :  { %2228 = vmatpush3.bf16.msra.mxu1 %v2493_v47  ;;  %2250 = vmatpush3.bf16.msra.mxu0 %v2494_v48 }
 0x9e2   :  { %2229 = vmatprep.subr.bf16.mxu1 %v2495_v51  ;;  %2251 = vmatprep.subr.bf16.mxu0 %v2496_v52 }
 0x9e5   :  { %2230 = vmatpush3.bf16.msra.mxu1 %v2497_v54  ;;  %2252 = vmatpush3.bf16.msra.mxu0 %v2498_v55 }
 0x9e6   :  { %2231 = vmatprep.subr.bf16.mxu1 %v2499_v56  ;;  %2253 = vmatprep.subr.bf16.mxu0 %v2500_v57 }
 0x9e9   :  { %2232 = vmatpush3.bf16.msra.mxu1 %v2501_v58  ;;  %2254 = vmatpush3.bf16.msra.mxu0 %v2502_v59 }
 0x9ea   :  { %2233 = vmatprep.subr.bf16.mxu1 %v2503_v60  ;;  %2255 = vmatprep.subr.bf16.mxu0 %v2504_v61 }
 0x9ed   :  { %2234 = vmatpush3.bf16.msra.mxu1 %v2505_v62  ;;  %2256 = vmatpush3.bf16.msra.mxu0 %v2506_v63 }
 0x9ee   :  { %2235 = vmatprep.subr.bf16.mxu1 %v2507_v2  ;;  %2257 = vmatprep.subr.bf16.mxu0 %v2508_v3 }
 0x9f1   :  { %2236 = vmatpush3.bf16.msra.mxu1 %v2509_v4  ;;  %2258 = vmatpush3.bf16.msra.mxu0 %v2510_v6 }
 0xaa7   :  { %v1579_v15 = vpop.f32.mrb[24].mxu1  ;;  %v1620_v16 = vpop.f32.mrb[12].mxu0 }
 0xaa8   :  { %v1580_v17 = vadd.f32 %v1579_v15, %v1359_v9  ;;  %v1621_v18 = vadd.f32 %v1620_v16, %v1367_v10  ;;  %v1581_v19 = vpop.f32.mrb[25].mxu1  ;;  %v1622_v20 = vpop.f32.mrb[13].mxu0 }
 0xaa9   :  { %v1582_v21 = vadd.f32 %v1581_v19, %v1363_v11  ;;  %v1623_v22 = vadd.f32 %v1622_v20, %v1371_v14  ;;  %v1583_v23 = vpop.f32.mrb[26].mxu1  ;;  %v1624_v24 = vpop.f32.mrb[14].mxu0 }
 0xaaa   :  { %v1627_v25 = vmax.f32 %v1580_v17, 0.0  ;;  %v1629_v26 = vmax.f32 %v1621_v18, 0.0  ;;  %v1584_v27 = vpop.f32.mrb[27].mxu1  ;;  %v1625_v53 = vpop.f32.mrb[15].mxu0 }
 0xaab   :  { %v1628_v1 = vmax.f32 %v1582_v21, 0.0  ;;  %v1630_v49 = vmax.f32 %v1623_v22, 0.0 }
 0xaac   :  { %v1631_v50 = vpack.c.bf16 %v1627_v25, %v1627_v25  ;;  %v1633_v29 = vpack.c.bf16 %v1629_v26, %v1629_v26 }
 0xaad   :  { %v1632_v5 = vpack.c.bf16 %v1628_v1, %v1628_v1  ;;  %v1634_v28 = vpack.c.bf16 %v1630_v49, %v1630_v49 }
 0xaaf   :  { %1930 = vmatprep.mubr.bf16.mxu1 %v1632_v5  ;;  %1970 = vmatprep.mubr.bf16.mxu0 %v1634_v28 }
 0xab0   :  { %1931 = vmatmul.mubr.bf16.vlgmr.msra.gmra.mrb[28].mxu1 %v1631_v50  ;;  %1971 = vmatmul.mubr.bf16.vlgmr.msra.gmra.mrb[16].mxu0 %v1633_v29 }
 0xb83   :  { %v2237_v30 = vpop.f32.mrb[28].mxu1  ;;  %v2259_v31 = vpop.f32.mrb[16].mxu0 }
 0xb84   :  { %v2238_v33 = vpop.f32.mrb[29].mxu1  ;;  %v2260_v0 = vpop.f32.mrb[17].mxu0 }
 0xb85   :  { %v2239_v34 = vadd.f32 %v2238_v33, %v2237_v30  ;;  %v2261_v36 = vadd.f32 %v2260_v0, %v2259_v31  ;;  %v2240_v38 = vpop.f32.mrb[30].mxu1  ;;  %v2262_v35 = vpop.f32.mrb[18].mxu0 }
 0xb86   :  { %v2241_v39 = vpop.f32.mrb[31].mxu1  ;;  %v2263_v12 = vpop.f32.mrb[19].mxu0 }
 0xb87   :  { %v1933_v40 = vadd.f32 %v2239_v34, %v2139_v32 }
 0xb89   :  { %v1973_v37 = vadd.f32 %v2261_v36, %v1933_v40 }
 0xb8b   :  { %v2172_v13 = vmul.f32 -1.442695, %v1973_v37 }
 0xb8d   :  { %2535 = vpow2.f32 %v2172_v13 }
 0xb97   :  { %v2536_v42 = vpop.eup %2535 }
 0xb98   :  { %v1981_v44 = vadd.f32 1.0, %v2536_v42 }
 0xb9a   :  { %2537 = vrcp.f32 %v1981_v44 }
 0xba4   :  { %v2538_v41 = vpop.eup %2537 }
 0xba5   :  { %1984 = vst [vmem:[#allocation19] sm:$0x3] %v2538_v41 }
 0xba6   :  { %2736 = shalt.err (!%p2733_p1)
}
 0xba7   :  { %s2737_s21 = scalar_lea.hbm %s3212_s20, 32 }
 0xba8   :  { %p2738_p2 = scmp.ne.s32.totalorder %s3212_s20, %s2737_s21  ;;  %p2741_p3 = scmp.lt.u32.totalorder %s2737_s21, %s3212_s20 }
 0xbaa   :  { %p2743_p4 = pnand %p2741_p3, %p2738_p2 }
 0xbac   :  { %2746 = shalt.err (!%p2743_p4)
}
 0xbad   :  { %1994 = dma.vmem_to_hbm [thread:$0]  %s1992_s23, 32, %s3212_s20, [#allocation7]  }
 0xbae   :  { %2759 = dma.done.wait [#allocation7], 32  }
 0xbaf   :  { %2760 = vsyncadd [#allocation7], 4294967264 }
 0xbb0   :  { %1998 = vsyncpa [#allocation6], 1 }
 0xbb1   :  { %1999 = vsyncpa [#allocation9], 1 }
 0xbb2   :  { %2000 = vsyncpa [#allocation12], 1 }
 0xbb3   :  { %2001 = vsyncpa [#allocation15], 1 }
 0xbb4   :  { %2002 = vsyncpa [#allocation18], 1 }
 0xbb5   :  { %2003 = vsyncpa [#allocation7], 1 }

</bundles_post_ra>
